<compile_context>
chip_gen: v7x
topology: tpu7x:2x2x1
jax: 0.10.0
libtpu: 0.0.40
codegen_flags: <defaults>
</compile_context>

<pallas_src>
import jax
import jax.numpy as jnp
from jax.experimental import pallas as pl
from jax.experimental.pallas import tpu as pltpu

POINT_NET_EMBEDDING_DIM = 32
DEFAULT_HEAD_HIDDEN_LAYER_SIZES = [64, 64]
NUM_HEADS = 6
OUT_6D = 6


# ----------------------------- Pallas kernel --------------------------------
def _multihead_mlp_kernel(x_ref, w1_ref, b1_ref, w2_ref, b2_ref, w3_ref, b3_ref, o_ref):
    # All 6 heads in one shot:
    #   layer1: (B,D) @ (D,6*H1)          -- heads stacked along N
    #   layer2: (B,6*H1) @ blockdiag W2   -- per-head independence preserved
    #   layer3: (B,6*H2) @ blockdiag W3   -- (B, 6*6) lane-contiguous output
    x = x_ref[...]                                                             # (B, D)
    h1 = jnp.dot(x, w1_ref[...], preferred_element_type=jnp.float32) + b1_ref[...]
    h1 = jnp.maximum(h1, 0.0)                                                  # (B, 6*H1)
    h2 = jnp.dot(h1, w2_ref[...], preferred_element_type=jnp.float32) + b2_ref[...]
    h2 = jnp.maximum(h2, 0.0)                                                  # (B, 6*H2)
    y = jnp.dot(h2, w3_ref[...], preferred_element_type=jnp.float32) + b3_ref[...]
    o_ref[...] = y.astype(o_ref.dtype)                                         # (B, 36)


def multihead_mlp(x, packed_params):
    """All 6 head MLPs in one kernel invocation. x: (B, D) -> (B, NUM_HEADS*6)."""
    w1s, b1s, w2bd, b2s, w3bd, b3s = packed_params
    B, D = x.shape
    N1 = w1s.shape[1]          # 6 * H1
    N2 = w2bd.shape[1]         # 6 * H2
    N3 = w3bd.shape[1]         # 6 * 6 = 36
    return pl.pallas_call(
        _multihead_mlp_kernel,
        out_shape=jax.ShapeDtypeStruct((B, N3), jnp.float32),
        grid_spec=pltpu.PrefetchScalarGridSpec(
            num_scalar_prefetch=0,
            grid=(1,),                                       # single invocation
            in_specs=[
                pl.BlockSpec((B, D), lambda i: (0, 0)),      # x
                pl.BlockSpec((D, N1), lambda i: (0, 0)),     # W1 head-stacked
                pl.BlockSpec((1, N1), lambda i: (0, 0)),     # b1
                pl.BlockSpec((N1, N2), lambda i: (0, 0)),    # W2 block-diagonal
                pl.BlockSpec((1, N2), lambda i: (0, 0)),     # b2
                pl.BlockSpec((N2, N3), lambda i: (0, 0)),    # W3 block-diagonal
                pl.BlockSpec((1, N3), lambda i: (0, 0)),     # b3
            ],
            out_specs=pl.BlockSpec((B, N3), lambda i: (0, 0)),
        ),
        compiler_params=pltpu.CompilerParams(dimension_semantics=("arbitrary",)),
    )(x, w1s, b1s, w2bd, b2s, w3bd, b3s)


# ------------------------- weight packing (host/JAX) -------------------------
def _block_diag(w):
    """(H, din, dout) per-head weights -> (H*din, H*dout) block-diagonal matrix."""
    H, di, do = w.shape
    out = jnp.zeros((H * di, H * do), w.dtype)
    for h in range(H):
        out = out.at[h * di:(h + 1) * di, h * do:(h + 1) * do].set(w[h])
    return out


def pack_params(params):
    """Per-head params (H, in, out)/(H, 1, out) -> head-stacked / block-diag layout."""
    w1, b1, w2, b2, w3, b3 = params
    H, D, H1 = w1.shape
    H2 = w2.shape[-1]
    O = w3.shape[-1]
    w1s = jnp.transpose(w1, (1, 0, 2)).reshape(D, H * H1)   # heads along output axis
    b1s = b1.reshape(1, H * H1)
    w2bd = _block_diag(w2)
    b2s = b2.reshape(1, H * H2)
    w3bd = _block_diag(w3)
    b3s = b3.reshape(1, H * O)
    return (w1s, b1s, w2bd, b2s, w3bd, b3s)


# ------------------------------ JAX glue -------------------------------------
def gram_schmidt(m, eps=1e-8):
    """(B, 2, 3) -> (B, 3, 3) rotation via 6D Gram-Schmidt (rows). eps-clamped norms."""
    a1, a2 = m[:, 0, :], m[:, 1, :]
    b1 = a1 / jnp.maximum(jnp.linalg.norm(a1, axis=-1, keepdims=True), eps)
    u2 = a2 - jnp.sum(b1 * a2, axis=-1, keepdims=True) * b1
    b2 = u2 / jnp.maximum(jnp.linalg.norm(u2, axis=-1, keepdims=True), eps)
    b3 = jnp.cross(b1, b2)
    return jnp.stack([b1, b2, b3], axis=1)


def svd_projection(m):
    """Project (possibly batched) 3x3 matrices to nearest rotation via SVD."""
    # TODO(synk): batched tiny-3x3 SVD has no clean Pallas equivalent; kept in plain JAX.
    u, _, vh = jnp.linalg.svd(m, full_matrices=False)
    det = jnp.linalg.det(jnp.matmul(u, vh))
    d = jnp.stack([jnp.ones_like(det), jnp.ones_like(det), det], axis=-1)
    return jnp.matmul(u * d[..., None, :], vh)


def multi_head_forward(x, params):
    B = x.shape[0]
    packed = pack_params(params)
    y = multihead_mlp(x, packed)                                   # (B, 6*6), head-major lanes
    six_d = jnp.transpose(y.reshape(B, NUM_HEADS, 2, 3), (1, 0, 2, 3))  # (6, B, 2, 3)
    gs = jax.vmap(gram_schmidt)(six_d)                             # (6, B, 3, 3)

    # Assemble the 6 candidate rotations exactly as the torch index assignments do.
    # TODO(synk): this VPU-only assembly/mean could be fused into the kernel; left in JAX.
    out0 = gs[0]
    out1 = -gs[1][:, jnp.array([0, 2, 1]), :]
    out2 = gs[2][:, jnp.array([2, 0, 1]), :]
    out3 = jnp.swapaxes(gs[3], 1, 2)
    out4 = -jnp.swapaxes(gs[4][:, jnp.array([0, 2, 1]), :], 1, 2)
    out5 = jnp.swapaxes(gs[5][:, jnp.array([2, 0, 1]), :], 1, 2)

    emb = (out0 + out1 + out2 + out3 + out4 + out5) / 6.0          # mean over heads, (B,3,3)
    if B == 1:                                                     # explicit torch .squeeze()
        emb = emb[0]
    return svd_projection(emb)


def init_params(key, in_dim, hidden_sizes, out_dim, num_heads):
    """Deterministic PyTorch-Linear-style init, stacked over heads."""
    h1, h2 = hidden_sizes
    ks = jax.random.split(key, 6)

    def u(k, shape, fan_in):
        bound = 1.0 / jnp.sqrt(jnp.float32(fan_in))
        return jax.random.uniform(k, shape, jnp.float32, -bound, bound)

    w1 = u(ks[0], (num_heads, in_dim, h1), in_dim)
    b1 = u(ks[1], (num_heads, 1, h1), in_dim)
    w2 = u(ks[2], (num_heads, h1, h2), h1)
    b2 = u(ks[3], (num_heads, 1, h2), h1)
    w3 = u(ks[4], (num_heads, h2, out_dim), h2)
    b3 = u(ks[5], (num_heads, 1, out_dim), h2)
    return (w1, b1, w2, b2, w3, b3)


if __name__ == "__main__":
    key = jax.random.PRNGKey(0)
    kx, kp = jax.random.split(key)

    batch = 2
    in_dim = 2 * POINT_NET_EMBEDDING_DIM  # siamese=True -> 64
    x = jax.random.normal(kx, (batch, in_dim), jnp.float32)
    params = init_params(kp, in_dim, DEFAULT_HEAD_HIDDEN_LAYER_SIZES, OUT_6D, NUM_HEADS)

    fwd = jax.jit(multi_head_forward)       # fuse packing + glue around the Pallas call
    out = fwd(x, params)                    # (batch, 3, 3) rotation matrices
    jax.block_until_ready(out)
    assert out.shape == (batch, 3, 3)
    assert bool(jnp.all(jnp.isfinite(out)))
    print("KERNEL_OK")
</pallas_src>

<mosaic_0001>
module attributes {stable_mosaic.version = 11 : i64} {
  func.func @_multihead_mlp_kernel(%arg0: i32, %arg1: memref<2x64xf32, #tpu.memory_space<vmem>>, %arg2: memref<64x384xf32, #tpu.memory_space<vmem>>, %arg3: memref<1x384xf32, #tpu.memory_space<vmem>>, %arg4: memref<384x384xf32, #tpu.memory_space<vmem>>, %arg5: memref<1x384xf32, #tpu.memory_space<vmem>>, %arg6: memref<384x36xf32, #tpu.memory_space<vmem>>, %arg7: memref<1x36xf32, #tpu.memory_space<vmem>>, %arg8: memref<2x36xf32, #tpu.memory_space<vmem>>) attributes {dimension_semantics = [#tpu.dimension_semantics<arbitrary>], iteration_bounds = array<i64: 1>, scalar_prefetch = 0 : i64, scratch_operands = 0 : i64, tpu.core_type = #tpu.core_type<tc>, window_params = [{pipeline_mode = #tpu.pipeline_mode<synchronous>, transform_indices = @transform_0, window_bounds = array<i64: 2, 64>}, {pipeline_mode = #tpu.pipeline_mode<synchronous>, transform_indices = @transform_1, window_bounds = array<i64: 64, 384>}, {pipeline_mode = #tpu.pipeline_mode<synchronous>, transform_indices = @transform_2, window_bounds = array<i64: 1, 384>}, {pipeline_mode = #tpu.pipeline_mode<synchronous>, transform_indices = @transform_3, window_bounds = array<i64: 384, 384>}, {pipeline_mode = #tpu.pipeline_mode<synchronous>, transform_indices = @transform_4, window_bounds = array<i64: 1, 384>}, {pipeline_mode = #tpu.pipeline_mode<synchronous>, transform_indices = @transform_5, window_bounds = array<i64: 384, 36>}, {pipeline_mode = #tpu.pipeline_mode<synchronous>, transform_indices = @transform_6, window_bounds = array<i64: 1, 36>}, {pipeline_mode = #tpu.pipeline_mode<synchronous>, transform_indices = @transform_7, window_bounds = array<i64: 2, 36>}]} {
    %c0 = arith.constant 0 : index
    %c0_0 = arith.constant 0 : index
    %0 = vector.load %arg1[%c0, %c0_0] : memref<2x64xf32, #tpu.memory_space<vmem>>, vector<2x64xf32>
    %c0_1 = arith.constant 0 : index
    %c0_2 = arith.constant 0 : index
    %1 = vector.load %arg2[%c0_1, %c0_2] : memref<64x384xf32, #tpu.memory_space<vmem>>, vector<64x384xf32>
    %cst = arith.constant dense<0.000000e+00> : vector<2x384xf32>
    %2 = tpu.matmul %0, %1, %cst {dimension_numbers = #tpu.dot_dimension_numbers<[1], [0], [0], [1], [0, 0, 1, 1], [], []>} : vector<2x64xf32>, vector<64x384xf32>, vector<2x384xf32> -> vector<2x384xf32>
    %c0_3 = arith.constant 0 : index
    %c0_4 = arith.constant 0 : index
    %3 = vector.load %arg3[%c0_3, %c0_4] : memref<1x384xf32, #tpu.memory_space<vmem>>, vector<1x384xf32>
    %4 = vector.broadcast %3 : vector<1x384xf32> to vector<2x384xf32>
    %5 = arith.addf %2, %4 : vector<2x384xf32>
    %cst_5 = arith.constant 0.000000e+00 : f32
    %6 = vector.broadcast %cst_5 : f32 to vector<2x384xf32>
    %7 = arith.maximumf %5, %6 : vector<2x384xf32>
    %c0_6 = arith.constant 0 : index
    %c0_7 = arith.constant 0 : index
    %8 = vector.load %arg4[%c0_6, %c0_7] : memref<384x384xf32, #tpu.memory_space<vmem>>, vector<384x384xf32>
    %cst_8 = arith.constant dense<0.000000e+00> : vector<2x384xf32>
    %9 = tpu.matmul %7, %8, %cst_8 {dimension_numbers = #tpu.dot_dimension_numbers<[1], [0], [0], [1], [0, 0, 1, 1], [], []>} : vector<2x384xf32>, vector<384x384xf32>, vector<2x384xf32> -> vector<2x384xf32>
    %c0_9 = arith.constant 0 : index
    %c0_10 = arith.constant 0 : index
    %10 = vector.load %arg5[%c0_9, %c0_10] : memref<1x384xf32, #tpu.memory_space<vmem>>, vector<1x384xf32>
    %11 = vector.broadcast %10 : vector<1x384xf32> to vector<2x384xf32>
    %12 = arith.addf %9, %11 : vector<2x384xf32>
    %cst_11 = arith.constant 0.000000e+00 : f32
    %13 = vector.broadcast %cst_11 : f32 to vector<2x384xf32>
    %14 = arith.maximumf %12, %13 : vector<2x384xf32>
    %c0_12 = arith.constant 0 : index
    %c0_13 = arith.constant 0 : index
    %15 = vector.load %arg6[%c0_12, %c0_13] : memref<384x36xf32, #tpu.memory_space<vmem>>, vector<384x36xf32>
    %cst_14 = arith.constant dense<0.000000e+00> : vector<2x36xf32>
    %16 = tpu.matmul %14, %15, %cst_14 {dimension_numbers = #tpu.dot_dimension_numbers<[1], [0], [0], [1], [0, 0, 1, 1], [], []>} : vector<2x384xf32>, vector<384x36xf32>, vector<2x36xf32> -> vector<2x36xf32>
    %c0_15 = arith.constant 0 : index
    %c0_16 = arith.constant 0 : index
    %17 = vector.load %arg7[%c0_15, %c0_16] : memref<1x36xf32, #tpu.memory_space<vmem>>, vector<1x36xf32>
    %18 = vector.broadcast %17 : vector<1x36xf32> to vector<2x36xf32>
    %19 = arith.addf %16, %18 : vector<2x36xf32>
    %c0_17 = arith.constant 0 : index
    %c0_18 = arith.constant 0 : index
    %20 = vector.load %arg8[%c0_17, %c0_18] : memref<2x36xf32, #tpu.memory_space<vmem>>, vector<2x36xf32>
    tpu.vector_store %arg8[%c0_17, %c0_18], %19 {strides = array<i32>} : memref<2x36xf32, #tpu.memory_space<vmem>>, vector<2x36xf32>,
    return
  }
  func.func @transform_0(%arg0: i32) -> (i32, i32) {
    %c0_i32 = arith.constant 0 : i32
    %c0_i32_0 = arith.constant 0 : i32
    %c0_i32_1 = arith.constant 0 : i32
    return %c0_i32, %c0_i32_0 : i32, i32
  }
  func.func @transform_1(%arg0: i32) -> (i32, i32) {
    %c0_i32 = arith.constant 0 : i32
    %c0_i32_0 = arith.constant 0 : i32
    %c0_i32_1 = arith.constant 0 : i32
    return %c0_i32, %c0_i32_0 : i32, i32
  }
  func.func @transform_2(%arg0: i32) -> (i32, i32) {
    %c0_i32 = arith.constant 0 : i32
    %c0_i32_0 = arith.constant 0 : i32
    %c0_i32_1 = arith.constant 0 : i32
    return %c0_i32, %c0_i32_0 : i32, i32
  }
  func.func @transform_3(%arg0: i32) -> (i32, i32) {
    %c0_i32 = arith.constant 0 : i32
    %c0_i32_0 = arith.constant 0 : i32
    %c0_i32_1 = arith.constant 0 : i32
    return %c0_i32, %c0_i32_0 : i32, i32
  }
  func.func @transform_4(%arg0: i32) -> (i32, i32) {
    %c0_i32 = arith.constant 0 : i32
    %c0_i32_0 = arith.constant 0 : i32
    %c0_i32_1 = arith.constant 0 : i32
    return %c0_i32, %c0_i32_0 : i32, i32
  }
  func.func @transform_5(%arg0: i32) -> (i32, i32) {
    %c0_i32 = arith.constant 0 : i32
    %c0_i32_0 = arith.constant 0 : i32
    %c0_i32_1 = arith.constant 0 : i32
    return %c0_i32, %c0_i32_0 : i32, i32
  }
  func.func @transform_6(%arg0: i32) -> (i32, i32) {
    %c0_i32 = arith.constant 0 : i32
    %c0_i32_0 = arith.constant 0 : i32
    %c0_i32_1 = arith.constant 0 : i32
    return %c0_i32, %c0_i32_0 : i32, i32
  }
  func.func @transform_7(%arg0: i32) -> (i32, i32) {
    %c0_i32 = arith.constant 0 : i32
    %c0_i32_0 = arith.constant 0 : i32
    %c0_i32_1 = arith.constant 0 : i32
    return %c0_i32, %c0_i32_0 : i32, i32
  }
}

</mosaic_0001>

<bundles_post_ra>
// kernel: multi_head_forward.1
= control target key start
LH: loop header
LB: loop body
LE: loop exit
PB: predicated region body
PF: predicated region fallthrough
CT: control target
= control target key end

     0   :  { %v1311_v3 = vmov 0.0   ;;  %vm68_vm0 = vcmask 523264   ;;  %v1312_v48 = vmov 0.0|0.0   ;;  %vm1313_vm1 = vmmov 0   ;;  %s2073_s1 = inlined_call_operand.vmem [shape: f32[64,384], index: 1, kind: input, shape index: {}]   ;;  %s2074_s3 = inlined_call_operand.vmem [shape: f32[384,384], index: 3, kind: input, shape index: {}]   ;;  %s2075_s0 = inlined_call_operand.vmem [shape: f32[2,64], index: 0, kind: input, shape index: {}]   ;;  %s2076_s2 = inlined_call_operand.vmem [shape: f32[1,384], index: 2, kind: input, shape index: {}]   ;;  %s2077_s5 = inlined_call_operand.vmem [shape: f32[384,36], index: 5, kind: input, shape index: {}]   ;;  %s2078_s4 = inlined_call_operand.vmem [shape: f32[1,384], index: 4, kind: input, shape index: {}]   ;;  %s2079_s6 = inlined_call_operand.vmem [shape: f32[1,36], index: 6, kind: input, shape index: {}]   ;;  %s2080_s7 = inlined_call_operand.vmem [shape: f32[2,36], index: 7, kind: output, shape index: {}]  }
   0x1   :  { %v28_v0 = vld [vmem:[%s2073_s1 + $0x8] sm:$0xff]  ;;  %v31_v1 = vld [vmem:[%s2073_s1 + $0x20] sm:$0xff]  ;;  %136 = vmatprep.mubr.f32.mxu1 %v1311_v3  ;;  %v30_v5 = vld [vmem:[%s2073_s1 + $0x18] sm:$0xff]  ;;  %vm857_vm2 = vcmask 287744  }
   0x2   :  { %v27_v2 = vld [vmem:[%s2073_s1] sm:$0xff]  ;;  %v1068_v4 = vpack.c.bf16 %v31_v1, %v28_v0  ;;  %v34_v6 = vld [vmem:[%s2073_s1 + $0x38] sm:$0xff]  ;;  %v37_v7 = vld [vmem:[%s2073_s1 + $0x50] sm:$0xff] }
   0x3   :  { %v1070_v8 = vpack.c.bf16 %v30_v5, %v27_v2  ;;  %v1072_v9 = vpack.c.bf16 %v37_v7, %v34_v6  ;;  %v33_v10 = vld [vmem:[%s2073_s1 + $0x30] sm:$0xff]  ;;  %v36_v11 = vld [vmem:[%s2073_s1 + $0x48] sm:$0xff]  ;;  %v43_v13 = vld [vmem:[%s2073_s1 + $0x80] sm:$0xff] }
   0x4   :  { %v40_v12 = vld [vmem:[%s2073_s1 + $0x68] sm:$0xff]  ;;  %1069 = vmatprep.subr.bf16.mxu1 %v1068_v4  ;;  %v1074_v14 = vpack.c.bf16 %v36_v11, %v33_v10  ;;  %v39_v16 = vld [vmem:[%s2073_s1 + $0x60] sm:$0xff]  ;;  %v42_v17 = vld [vmem:[%s2073_s1 + $0x78] sm:$0xff] }
   0x5   :  { %1071 = vmatpush1.bf16.msra.mxu1 %v1070_v8  ;;  %v1076_v15 = vpack.c.bf16 %v43_v13, %v40_v12  ;;  %v46_v18 = vld [vmem:[%s2073_s1 + $0x98] sm:$0xff]  ;;  %v49_v19 = vld [vmem:[%s2073_s1 + $0xb0] sm:$0xff]  ;;  %v1078_v21 = vpack.c.bf16 %v42_v17, %v39_v16  ;;  %v48_v22 = vld [vmem:[%s2073_s1 + $0xa8] sm:$0xff] }
   0x6   :  { %1073 = vmatprep.subr.bf16.mxu1 %v1072_v9  ;;  %v45_v20 = vld [vmem:[%s2073_s1 + $0x90] sm:$0xff]  ;;  %v217_v23 = vld [vmem:[%s2074_s3 + $0x8] sm:$0xff]  ;;  %v220_v24 = vld [vmem:[%s2074_s3 + $0x20] sm:$0xff]  ;;  %v1080_v25 = vpack.c.bf16 %v49_v19, %v46_v18 }
   0x7   :  { %v1096_v26 = vpack.c.bf16 %v220_v24, %v217_v23  ;;  %v216_v27 = vld [vmem:[%s2074_s3] sm:$0xff]  ;;  %v219_v28 = vld [vmem:[%s2074_s3 + $0x18] sm:$0xff]  ;;  %v226_v31 = vld [vmem:[%s2074_s3 + $0x50] sm:$0xff]  ;;  %v1082_v37 = vpack.c.bf16 %v48_v22, %v45_v20 }
   0x8   :  { %v223_v29 = vld [vmem:[%s2074_s3 + $0x38] sm:$0xff]  ;;  %v1098_v30 = vpack.c.bf16 %v219_v28, %v216_v27  ;;  %v222_v32 = vld [vmem:[%s2074_s3 + $0x30] sm:$0xff]  ;;  %v225_v33 = vld [vmem:[%s2074_s3 + $0x48] sm:$0xff] }
   0x9   :  { %1075 = vmatpush1.bf16.msra.mxu1 %v1074_v14  ;;  %1097 = vmatprep.subr.bf16.mxu0 %v1096_v26  ;;  %v1100_v34 = vpack.c.bf16 %v226_v31, %v223_v29  ;;  %v229_v35 = vld [vmem:[%s2074_s3 + $0x68] sm:$0xff]  ;;  %v232_v36 = vld [vmem:[%s2074_s3 + $0x80] sm:$0xff]  ;;  %v1102_v38 = vpack.c.bf16 %v225_v33, %v222_v32  ;;  %v29_v39 = vld [vmem:[%s2073_s1 + $0x10] sm:$0xff] }
   0xa   :  { %1077 = vmatprep.subr.bf16.mxu1 %v1076_v15  ;;  %1099 = vmatpush1.bf16.msra.mxu0 %v1098_v30  ;;  %v32_v40 = vld [vmem:[%s2073_s1 + $0x28] sm:$0xff]  ;;  %v1104_v41 = vpack.c.bf16 %v232_v36, %v229_v35  ;;  %v228_v42 = vld [vmem:[%s2074_s3 + $0x60] sm:$0xff]  ;;  %v231_v43 = vld [vmem:[%s2074_s3 + $0x78] sm:$0xff] }
   0xb   :  { %1101 = vmatprep.subr.bf16.mxu0 %v1100_v34  ;;  %v235_v44 = vld [vmem:[%s2074_s3 + $0x98] sm:$0xff]  ;;  %v238_v45 = vld [vmem:[%s2074_s3 + $0xb0] sm:$0xff]  ;;  %v1454_v46 = vld [vmem:[%s2075_s0] sm:$0x3]  ;;  %v1085_v47 = vpack.c.bf16 %v32_v40, %v29_v39  ;;  %v1106_v51 = vpack.c.bf16 %v231_v43, %v228_v42 }
   0xc   :  { %v35_v49 = vld [vmem:[%s2073_s1 + $0x40] sm:$0xff]  ;;  %v38_v50 = vld [vmem:[%s2073_s1 + $0x58] sm:$0xff]  ;;  %v1108_v52 = vpack.c.bf16 %v238_v45, %v235_v44  ;;  %v234_v53 = vld [vmem:[%s2074_s3 + $0x90] sm:$0xff] }
   0xd   :  { %1079 = vmatpush1.bf16.msra.mxu1 %v1078_v21  ;;  %v237_v54 = vld [vmem:[%s2074_s3 + $0xa8] sm:$0xff]  ;;  %v244_v56 = vld [vmem:[%s2074_s3 + $0xe0] sm:$0xff]  ;;  %v1088_v57 = vpack.c.bf16 %v38_v50, %v35_v49  ;;  %v41_v58 = vld [vmem:[%s2073_s1 + $0x70] sm:$0xff] }
   0xe   :  { %1081 = vmatprep.subr.bf16.mxu1 %v1080_v25  ;;  %1103 = vmatpush1.bf16.msra.mxu0 %v1102_v38  ;;  %v241_v55 = vld [vmem:[%s2074_s3 + $0xc8] sm:$0xff]  ;;  %v1110_v60 = vpack.c.bf16 %v237_v54, %v234_v53  ;;  %v240_v62 = vld [vmem:[%s2074_s3 + $0xc0] sm:$0xff]  ;;  %v243_v63 = vld [vmem:[%s2074_s3 + $0xd8] sm:$0xff] }
   0xf   :  { %1105 = vmatprep.subr.bf16.mxu0 %v1104_v41  ;;  %v44_v59 = vld [vmem:[%s2073_s1 + $0x88] sm:$0xff]  ;;  %v1112_v61 = vpack.c.bf16 %v244_v56, %v241_v55  ;;  %v247_v0 = vld [vmem:[%s2074_s3 + $0xf8] sm:$0xff]  ;;  %v250_v1 = vld [vmem:[%s2074_s3 + $0x110] sm:$0xff]  ;;  %v1114_v6 = vpack.c.bf16 %v243_v63, %v240_v62 }
  0x10   :  { %v1091_v2 = vpack.c.bf16 %v44_v59, %v41_v58  ;;  %v47_v4 = vld [vmem:[%s2073_s1 + $0xa0] sm:$0xff]  ;;  %v50_v5 = vld [vmem:[%s2073_s1 + $0xb8] sm:$0xff]  ;;  %v246_v7 = vld [vmem:[%s2074_s3 + $0xf0] sm:$0xff]  ;;  %v1116_v8 = vpack.c.bf16 %v250_v1, %v247_v0 }
  0x11   :  { %1083 = vmatpush1.bf16.msra.mxu1 %v1082_v37  ;;  %v249_v9 = vld [vmem:[%s2074_s3 + $0x108] sm:$0xff]  ;;  %v266_v10 = vld [vmem:[%s2074_s3 + $0x190] sm:$0xff]  ;;  %v256_v13 = vld [vmem:[%s2074_s3 + $0x140] sm:$0xff]  ;;  %v1094_v14 = vpack.c.bf16 %v50_v5, %v47_v4 }
  0x12   :  { %1084 = vmatprep.subr.bf16.mxu1 %v1312_v48  ;;  %1107 = vmatpush1.bf16.msra.mxu0 %v1106_v51  ;;  %v269_v11 = vld [vmem:[%s2074_s3 + $0x1a8] sm:$0xff]  ;;  %v1118_v15 = vpack.c.bf16 %v249_v9, %v246_v7  ;;  %v252_v16 = vld [vmem:[%s2074_s3 + $0x120] sm:$0xff]  ;;  %v218_v18 = vld [vmem:[%s2074_s3 + $0x10] sm:$0xff] }
  0x13   :  { %1109 = vmatprep.subr.bf16.mxu0 %v1108_v52  ;;  %v253_v12 = vld [vmem:[%s2074_s3 + $0x128] sm:$0xff]  ;;  %v1192_v17 = vpack.c.bf16 %v269_v11, %v266_v10  ;;  %v255_v21 = vld [vmem:[%s2074_s3 + $0x138] sm:$0xff]  ;;  %v272_v22 = vld [vmem:[%s2074_s3 + $0x1c0] sm:$0xff] }
  0x14   :  { %863 = vmatmul.mubr.msk.f32.vlgmr.msra.gmra.mrb[0].mxu1 %vm68_vm0, %v1454_v46  ;;  %v221_v19 = vld [vmem:[%s2074_s3 + $0x28] sm:$0xff]  ;;  %v1120_v20 = vpack.c.bf16 %v256_v13, %v253_v12  ;;  %v275_v23 = vld [vmem:[%s2074_s3 + $0x1d8] sm:$0xff]  ;;  %v262_v25 = vld [vmem:[%s2074_s3 + $0x170] sm:$0xff]  ;;  %v1122_v27 = vpack.c.bf16 %v255_v21, %v252_v16 }
  0x15   :  { %1086 = vmatpush3.bf16.msra.mxu1 %v1085_v47  ;;  %995 = vmatprep.mubr.msk.f32.mxu1 %vm1313_vm1, %v1311_v3  ;;  %v259_v24 = vld [vmem:[%s2074_s3 + $0x158] sm:$0xff]  ;;  %v1194_v26 = vpack.c.bf16 %v221_v19, %v218_v18  ;;  %v258_v28 = vld [vmem:[%s2074_s3 + $0x150] sm:$0xff]  ;;  %v1196_v29 = vpack.c.bf16 %v275_v23, %v272_v22  ;;  %v224_v30 = vld [vmem:[%s2074_s3 + $0x40] sm:$0xff] }
  0x16   :  { %1087 = vmatprep.subr.bf16.mxu1 %v1312_v48  ;;  %1111 = vmatpush1.bf16.msra.mxu0 %v1110_v60  ;;  %v227_v31 = vld [vmem:[%s2074_s3 + $0x58] sm:$0xff]  ;;  %v1124_v32 = vpack.c.bf16 %v262_v25, %v259_v24  ;;  %v261_v33 = vld [vmem:[%s2074_s3 + $0x168] sm:$0xff]  ;;  %v278_v34 = vld [vmem:[%s2074_s3 + $0x1f0] sm:$0xff] }
  0x17   :  { %1113 = vmatprep.subr.bf16.mxu0 %v1112_v61  ;;  %v281_v35 = vld [vmem:[%s2074_s3 + $0x208] sm:$0xff]  ;;  %v268_v37 = vld [vmem:[%s2074_s3 + $0x1a0] sm:$0xff]  ;;  %v1198_v38 = vpack.c.bf16 %v227_v31, %v224_v30  ;;  %v1126_v39 = vpack.c.bf16 %v261_v33, %v258_v28  ;;  %v230_v42 = vld [vmem:[%s2074_s3 + $0x70] sm:$0xff] }
  0x18   :  { %v265_v36 = vld [vmem:[%s2074_s3 + $0x188] sm:$0xff]  ;;  %v264_v40 = vld [vmem:[%s2074_s3 + $0x180] sm:$0xff]  ;;  %v1200_v41 = vpack.c.bf16 %v281_v35, %v278_v34  ;;  %v267_v45 = vld [vmem:[%s2074_s3 + $0x198] sm:$0xff] }
  0x19   :  { %1089 = vmatpush3.bf16.msra.mxu1 %v1088_v57  ;;  %v233_v43 = vld [vmem:[%s2074_s3 + $0x88] sm:$0xff]  ;;  %v1128_v44 = vpack.c.bf16 %v268_v37, %v265_v36  ;;  %v287_v47 = vld [vmem:[%s2074_s3 + $0x238] sm:$0xff]  ;;  %v274_v50 = vld [vmem:[%s2074_s3 + $0x1d0] sm:$0xff]  ;;  %v1130_v52 = vpack.c.bf16 %v267_v45, %v264_v40 }
  0x1a   :  { %1090 = vmatprep.subr.bf16.mxu1 %v1312_v48  ;;  %1115 = vmatpush1.bf16.msra.mxu0 %v1114_v6  ;;  %v271_v49 = vld [vmem:[%s2074_s3 + $0x1b8] sm:$0xff]  ;;  %v1202_v51 = vpack.c.bf16 %v233_v43, %v230_v42  ;;  %v270_v53 = vld [vmem:[%s2074_s3 + $0x1b0] sm:$0xff]  ;;  %v236_v55 = vld [vmem:[%s2074_s3 + $0xa0] sm:$0xff] }
  0x1b   :  { %1117 = vmatprep.subr.bf16.mxu0 %v1116_v8  ;;  %v239_v56 = vld [vmem:[%s2074_s3 + $0xb8] sm:$0xff]  ;;  %v1132_v57 = vpack.c.bf16 %v274_v50, %v271_v49  ;;  %v273_v58 = vld [vmem:[%s2074_s3 + $0x1c8] sm:$0xff]  ;;  %v290_v59 = vld [vmem:[%s2074_s3 + $0x250] sm:$0xff] }
  0x1c   :  { %v293_v60 = vld [vmem:[%s2074_s3 + $0x268] sm:$0xff]  ;;  %v280_v62 = vld [vmem:[%s2074_s3 + $0x200] sm:$0xff]  ;;  %v1206_v63 = vpack.c.bf16 %v239_v56, %v236_v55  ;;  %v1134_v0 = vpack.c.bf16 %v273_v58, %v270_v53  ;;  %v242_v4 = vld [vmem:[%s2074_s3 + $0xd0] sm:$0xff] }
  0x1d   :  { %1092 = vmatpush3.bf16.msra.mxu1 %v1091_v2  ;;  %v277_v61 = vld [vmem:[%s2074_s3 + $0x1e8] sm:$0xff]  ;;  %v276_v1 = vld [vmem:[%s2074_s3 + $0x1e0] sm:$0xff]  ;;  %v1208_v2 = vpack.c.bf16 %v293_v60, %v290_v59  ;;  %v279_v7 = vld [vmem:[%s2074_s3 + $0x1f8] sm:$0xff] }
  0x1e   :  { %1093 = vmatprep.subr.bf16.mxu1 %v1312_v48  ;;  %1119 = vmatpush1.bf16.msra.mxu0 %v1118_v15  ;;  %v245_v5 = vld [vmem:[%s2074_s3 + $0xe8] sm:$0xff]  ;;  %v1136_v6 = vpack.c.bf16 %v280_v62, %v277_v61  ;;  %v296_v8 = vld [vmem:[%s2074_s3 + $0x280] sm:$0xff]  ;;  %v299_v9 = vld [vmem:[%s2074_s3 + $0x298] sm:$0xff]  ;;  %v1138_v13 = vpack.c.bf16 %v279_v7, %v276_v1  ;;  %v53_v62 = vlaneseq }
  0x1f   :  { %1121 = vmatprep.subr.bf16.mxu0 %v1120_v20  ;;  %v283_v10 = vld [vmem:[%s2074_s3 + $0x218] sm:$0xff]  ;;  %v286_v11 = vld [vmem:[%s2074_s3 + $0x230] sm:$0xff]  ;;  %v1210_v12 = vpack.c.bf16 %v245_v5, %v242_v4  ;;  %v1212_v15 = vpack.c.bf16 %v299_v9, %v296_v8  ;;  %v248_v16 = vld [vmem:[%s2074_s3 + $0x100] sm:$0xff] }
  0x20   :  { %v1140_v18 = vpack.c.bf16 %v286_v11, %v283_v10  ;;  %v285_v19 = vld [vmem:[%s2074_s3 + $0x228] sm:$0xff]  ;;  %v302_v20 = vld [vmem:[%s2074_s3 + $0x2b0] sm:$0xff]  ;;  %v292_v23 = vld [vmem:[%s2074_s3 + $0x260] sm:$0xff] }
  0x21   :  { %1095 = vmatpush3.bf16.msra.mxu1 %v1094_v14  ;;  %v282_v14 = vld [vmem:[%s2074_s3 + $0x210] sm:$0xff]  ;;  %v305_v21 = vld [vmem:[%s2074_s3 + $0x2c8] sm:$0xff]  ;;  %v288_v30 = vld [vmem:[%s2074_s3 + $0x240] sm:$0xff] }
  0x22   :  { %1193 = vmatprep.subr.bf16.mxu1 %v1192_v17  ;;  %1123 = vmatpush1.bf16.msra.mxu0 %v1122_v27  ;;  %v251_v17 = vld [vmem:[%s2074_s3 + $0x118] sm:$0xff]  ;;  %v289_v22 = vld [vmem:[%s2074_s3 + $0x248] sm:$0xff]  ;;  %v1142_v25 = vpack.c.bf16 %v285_v19, %v282_v14  ;;  %v254_v27 = vld [vmem:[%s2074_s3 + $0x130] sm:$0xff] }
  0x23   :  { %1125 = vmatprep.subr.bf16.mxu0 %v1124_v32  ;;  %v1214_v24 = vpack.c.bf16 %v251_v17, %v248_v16  ;;  %v257_v28 = vld [vmem:[%s2074_s3 + $0x148] sm:$0xff]  ;;  %v291_v31 = vld [vmem:[%s2074_s3 + $0x258] sm:$0xff]  ;;  %v298_v33 = vld [vmem:[%s2074_s3 + $0x290] sm:$0xff] }
  0x24   :  { %996 = vmatmul.mubr.msk.f32.vlgmr.msra.gmra.mrb[2].mxu1 %vm68_vm0, %v1454_v46  ;;  %v284_v46 = vld [vmem:[%s2074_s3 + $0x220] sm:$0xff]  ;;  %v295_v32 = vld [vmem:[%s2074_s3 + $0x278] sm:$0xff]  ;;  %v1218_v34 = vpack.c.bf16 %v257_v28, %v254_v27  ;;  %v1146_v35 = vpack.c.bf16 %v291_v31, %v288_v30  ;;  %v294_v37 = vld [vmem:[%s2074_s3 + $0x270] sm:$0xff] }
  0x25   :  { %1195 = vmatpush3.bf16.msra.mxu1 %v1194_v26  ;;  %v1204_v54 = vpack.c.bf16 %v287_v47, %v284_v46  ;;  %v1216_v26 = vpack.c.bf16 %v305_v21, %v302_v20  ;;  %v1148_v36 = vpack.c.bf16 %v298_v33, %v295_v32  ;;  %v304_v40 = vld [vmem:[%s2074_s3 + $0x2c0] sm:$0xff]  ;;  %v307_v46 = vld [vmem:[%s2074_s3 + $0x2d8] sm:$0xff]  ;;  %v310_v47 = vld [vmem:[%s2074_s3 + $0x2f0] sm:$0xff] }
  0x26   :  { %1197 = vmatprep.subr.bf16.mxu1 %v1196_v29  ;;  %1127 = vmatpush1.bf16.msra.mxu0 %v1126_v39  ;;  %v1144_v29 = vpack.c.bf16 %v292_v23, %v289_v22  ;;  %v301_v39 = vld [vmem:[%s2074_s3 + $0x2a8] sm:$0xff]  ;;  %v300_v43 = vld [vmem:[%s2074_s3 + $0x2a0] sm:$0xff]  ;;  %v1156_v50 = vpack.c.bf16 %v310_v47, %v307_v46  ;;  %v315_v10 = vld [vmem:[%s2074_s3 + $0x318] sm:$0xff] }
  0x27   :  { %1129 = vmatprep.subr.bf16.mxu0 %v1128_v44  ;;  %v1152_v42 = vpack.c.bf16 %v304_v40, %v301_v39  ;;  %v303_v44 = vld [vmem:[%s2074_s3 + $0x2b8] sm:$0xff]  ;;  %v308_v49 = vld [vmem:[%s2074_s3 + $0x2e0] sm:$0xff]  ;;  %v309_v53 = vld [vmem:[%s2074_s3 + $0x2e8] sm:$0xff] }
  0x28   :  { %v1154_v45 = vpack.c.bf16 %v303_v44, %v300_v43  ;;  %v260_v56 = vld [vmem:[%s2074_s3 + $0x160] sm:$0xff]  ;;  %v313_v59 = vld [vmem:[%s2074_s3 + $0x308] sm:$0xff]  ;;  %v314_v11 = vld [vmem:[%s2074_s3 + $0x310] sm:$0xff] }
  0x29   :  { %1199 = vmatpush3.bf16.msra.mxu1 %v1198_v38  ;;  %v297_v38 = vld [vmem:[%s2074_s3 + $0x288] sm:$0xff]  ;;  %v316_v60 = vld [vmem:[%s2074_s3 + $0x320] sm:$0xff]  ;;  %v319_v14 = vld [vmem:[%s2074_s3 + $0x338] sm:$0xff] }
  0x2a   :  { %1201 = vmatprep.subr.bf16.mxu1 %v1200_v41  ;;  %1131 = vmatpush1.bf16.msra.mxu0 %v1130_v52  ;;  %v1150_v41 = vpack.c.bf16 %v297_v38, %v294_v37  ;;  %v306_v52 = vld [vmem:[%s2074_s3 + $0x2d0] sm:$0xff]  ;;  %v1160_v61 = vpack.c.bf16 %v316_v60, %v313_v59  ;;  %v1743_v1 = vld [vmem:[%s2076_s2] sm:$0x7]  ;;  %v321_v22 = vld [vmem:[%s2074_s3 + $0x348] sm:$0xff] }
  0x2b   :  { %1133 = vmatprep.subr.bf16.mxu0 %v1132_v57  ;;  %v1158_v55 = vpack.c.bf16 %v309_v53, %v306_v52  ;;  %v263_v57 = vld [vmem:[%s2074_s3 + $0x178] sm:$0xff]  ;;  %v312_v7 = vld [vmem:[%s2074_s3 + $0x300] sm:$0xff]  ;;  %v318_v19 = vld [vmem:[%s2074_s3 + $0x330] sm:$0xff] }
  0x2c   :  { %v1222_v58 = vpack.c.bf16 %v263_v57, %v260_v56  ;;  %v1162_v17 = vpack.c.bf16 %v315_v10, %v312_v7  ;;  %v320_v23 = vld [vmem:[%s2074_s3 + $0x340] sm:$0xff]  ;;  %v1166_v27 = vpack.c.bf16 %v321_v22, %v318_v19  ;;  %v327_v31 = vld [vmem:[%s2074_s3 + $0x378] sm:$0xff]  ;;  %v326_v32 = vld [vmem:[%s2074_s3 + $0x370] sm:$0xff] }
  0x2d   :  { %1203 = vmatpush3.bf16.msra.mxu1 %v1202_v51  ;;  %v311_v51 = vld [vmem:[%s2074_s3 + $0x2f8] sm:$0xff]  ;;  %v329_v33 = vld [vmem:[%s2074_s3 + $0x388] sm:$0xff]  ;;  %v330_v38 = vld [vmem:[%s2074_s3 + $0x390] sm:$0xff] }
  0x2e   :  { %1205 = vmatprep.subr.bf16.mxu1 %v1204_v54  ;;  %1135 = vmatpush1.bf16.msra.mxu0 %v1134_v0  ;;  %v1220_v54 = vpack.c.bf16 %v311_v51, %v308_v49  ;;  %v1231_v37 = vpack.c.bf16 %v329_v33, %v326_v32  ;;  %v333_v40 = vld [vmem:[%s2074_s3 + $0x3a8] sm:$0xff]  ;;  %v340_v44 = vld [vmem:[%s2074_s3 + $0x3e0] sm:$0xff]  ;;  %v339_v51 = vld [vmem:[%s2074_s3 + $0x3d8] sm:$0xff] }
  0x2f   :  { %1137 = vmatprep.subr.bf16.mxu0 %v1136_v6  ;;  %v337_v43 = vld [vmem:[%s2074_s3 + $0x3c8] sm:$0xff]  ;;  %v336_v47 = vld [vmem:[%s2074_s3 + $0x3c0] sm:$0xff]  ;;  %v338_v52 = vld [vmem:[%s2074_s3 + $0x3d0] sm:$0xff] }
  0x30   :  { %v341_v53 = vld [vmem:[%s2074_s3 + $0x3e8] sm:$0xff]  ;;  %v346_v56 = vld [vmem:[%s2074_s3 + $0x410] sm:$0xff]  ;;  %v1178_v57 = vpack.c.bf16 %v339_v51, %v336_v47  ;;  %v348_v10 = vld [vmem:[%s2074_s3 + $0x420] sm:$0xff] }
  0x31   :  { %1207 = vmatpush3.bf16.msra.mxu1 %v1206_v63  ;;  %v1737_v63 = vshrl.u32 %v53_v62, 7  ;;  %v342_v59 = vld [vmem:[%s2074_s3 + $0x3f0] sm:$0xff]  ;;  %v344_v62 = vld [vmem:[%s2074_s3 + $0x400] sm:$0xff]  ;;  %v357_v22 = vld [vmem:[%s2074_s3 + $0x468] sm:$0xff] }
  0x32   :  { %1209 = vmatprep.subr.bf16.mxu1 %v1208_v2  ;;  %1139 = vmatpush1.bf16.msra.mxu0 %v1138_v13  ;;  %v679_v32 = vld [vmem:[%s2077_s5 + $0x88] sm:$0xff]  ;;  %v666_v51 = vld [vmem:[%s2077_s5 + $0x20] sm:$0xff] }
  0x33   :  { %1141 = vmatprep.subr.bf16.mxu0 %v1140_v18  ;;  %v55_v0 = vsub.s32 0, %v1737_v63  ;;  %v59_v2 = vsub.s32 1, %v1737_v63  ;;  %v63_v7 = vsub.s32 2, %v1737_v63  ;;  %v663_v33 = vld [vmem:[%s2077_s5 + $0x8] sm:$0xff]  ;;  %v865_v63 = vld [vmem:[%s2079_s6] ss:$0 sm:$0xff] }
  0x35   :  { %1211 = vmatpush3.bf16.msra.mxu1 %v1210_v12  ;;  %v56_v4 = vrot.slane %v1743_v1, %v55_v0  ;;  %v60_v5 = vrot.slane %v1743_v1, %v59_v2  ;;  %v317_v12 = vld [vmem:[%s2074_s3 + $0x328] sm:$0xff] }
  0x36   :  { %1213 = vmatprep.subr.bf16.mxu1 %v1212_v15  ;;  %1143 = vmatpush1.bf16.msra.mxu0 %v1142_v25  ;;  %v322_v15 = vld [vmem:[%s2074_s3 + $0x350] sm:$0xff]  ;;  %v1225_v18 = vpack.c.bf16 %v317_v12, %v314_v11  ;;  %v325_v25 = vld [vmem:[%s2074_s3 + $0x368] sm:$0xff]  ;;  %v351_v12 = vld [vmem:[%s2074_s3 + $0x438] sm:$0xff] }
  0x37   :  { %1145 = vmatprep.subr.bf16.mxu0 %v1144_v29  ;;  %v1164_v21 = vpack.c.bf16 %v322_v15, %v319_v14  ;;  %v324_v29 = vld [vmem:[%s2074_s3 + $0x360] sm:$0xff]  ;;  %v353_v14 = vld [vmem:[%s2074_s3 + $0x448] sm:$0xff]  ;;  %v355_v15 = vld [vmem:[%s2074_s3 + $0x458] sm:$0xff] }
  0x39   :  { %1215 = vmatpush3.bf16.msra.mxu1 %v1214_v24  ;;  %v323_v24 = vld [vmem:[%s2074_s3 + $0x358] sm:$0xff] }
  0x3a   :  { %1217 = vmatprep.subr.bf16.mxu1 %v1216_v26  ;;  %1147 = vmatpush1.bf16.msra.mxu0 %v1146_v35  ;;  %v328_v26 = vld [vmem:[%s2074_s3 + $0x380] sm:$0xff]  ;;  %v1228_v28 = vpack.c.bf16 %v323_v24, %v320_v23  ;;  %v334_v35 = vld [vmem:[%s2074_s3 + $0x3b0] sm:$0xff]  ;;  %v359_v23 = vld [vmem:[%s2074_s3 + $0x478] sm:$0xff] }
  0x3b   :  { %1149 = vmatprep.subr.bf16.mxu0 %v1148_v36  ;;  %v1168_v30 = vpack.c.bf16 %v328_v26, %v325_v25  ;;  %v1170_v36 = vpack.c.bf16 %v327_v31, %v324_v29  ;;  %v695_v29 = vld [vmem:[%s2077_s5 + $0x108] sm:$0xff] }
  0x3d   :  { %1219 = vmatpush3.bf16.msra.mxu1 %v1218_v34  ;;  %v331_v34 = vld [vmem:[%s2074_s3 + $0x398] sm:$0xff] }
  0x3e   :  { %1151 = vmatpush1.bf16.msra.mxu0 %v1150_v41  ;;  %1221 = vmatprep.subr.bf16.mxu1 %v1220_v54  ;;  %v1172_v39 = vpack.c.bf16 %v334_v35, %v331_v34  ;;  %v332_v41 = vld [vmem:[%s2074_s3 + $0x3a0] sm:$0xff] }
  0x3f   :  { %1153 = vmatprep.subr.bf16.mxu0 %v1152_v42  ;;  %v335_v42 = vld [vmem:[%s2074_s3 + $0x3b8] sm:$0xff] }
  0x40   :  { %v1234_v46 = vpack.c.bf16 %v335_v42, %v332_v41  ;;  %v664_v41 = vld [vmem:[%s2077_s5 + $0x10] sm:$0xff]  ;;  %v665_v42 = vld [vmem:[%s2077_s5 + $0x18] sm:$0xff] }
  0x41   :  { %1223 = vmatpush3.bf16.msra.mxu1 %v1222_v58  ;;  %v1237_v58 = vpack.c.bf16 %v341_v53, %v338_v52  ;;  %v1254_v47 = vpack.c.bf16 %v665_v42, %v664_v41  ;;  %v667_v52 = vld [vmem:[%s2077_s5 + $0x28] sm:$0xff]  ;;  %v360_v42 = vld [vmem:[%s2078_s4] sm:$0x7] }
  0x42   :  { %1155 = vmatpush1.bf16.msra.mxu0 %v1154_v45  ;;  %1224 = vmatprep.subr.bf16.mxu1 %v1312_v48  ;;  %v1174_v45 = vpack.c.bf16 %v333_v40, %v330_v38  ;;  %v680_v38 = vld [vmem:[%s2077_s5 + $0x90] sm:$0xff]  ;;  %v681_v40 = vld [vmem:[%s2077_s5 + $0x98] sm:$0xff] }
  0x43   :  { %1157 = vmatprep.subr.bf16.mxu0 %v1156_v50  ;;  %v1176_v50 = vpack.c.bf16 %v340_v44, %v337_v43  ;;  %v1252_v43 = vpack.c.bf16 %v681_v40, %v680_v38  ;;  %v698_v44 = vld [vmem:[%s2077_s5 + $0x120] sm:$0xff] }
  0x46   :  { %1159 = vmatpush1.bf16.msra.mxu0 %v1158_v55  ;;  %v343_v55 = vld [vmem:[%s2074_s3 + $0x3f8] sm:$0xff] }
  0x47   :  { %1161 = vmatprep.subr.bf16.mxu0 %v1160_v61  ;;  %v1180_v60 = vpack.c.bf16 %v346_v56, %v343_v55  ;;  %v345_v61 = vld [vmem:[%s2074_s3 + $0x408] sm:$0xff]  ;;  %v685_v55 = vld [vmem:[%s2077_s5 + $0xb8] sm:$0xff]  ;;  %v700_v56 = vld [vmem:[%s2077_s5 + $0x130] sm:$0xff] }
  0xe7   :  { %v138_v6 = vpop.f32.mrb[0].mxu1 }
  0xe8   :  { %v139_v8 = vadd.f32 %v138_v6, %v56_v4  ;;  %v140_v9 = vpop.f32.mrb[1].mxu1  ;;  %v347_v4 = vld [vmem:[%s2074_s3 + $0x418] sm:$0xff]  ;;  %v352_v6 = vld [vmem:[%s2074_s3 + $0x440] sm:$0xff] }
  0xe9   :  { %v141_v13 = vadd.f32 %v140_v9, %v60_v5  ;;  %v349_v5 = vld [vmem:[%s2074_s3 + $0x428] sm:$0xff]  ;;  %v1240_v9 = vpack.c.bf16 %v347_v4, %v344_v62  ;;  %v686_v4 = vld [vmem:[%s2077_s5 + $0xc0] sm:$0xff] }
  0xea   :  { %v213_v20 = vmax.f32 %v139_v8, 0.0  ;;  %v1182_v8 = vpack.c.bf16 %v345_v61, %v342_v59  ;;  %v1184_v11 = vpack.c.bf16 %v352_v6, %v349_v5  ;;  %v669_v61 = vld [vmem:[%s2077_s5 + $0x38] sm:$0xff]  ;;  %v687_v5 = vld [vmem:[%s2077_s5 + $0xc8] sm:$0xff]  ;;  %v702_v6 = vld [vmem:[%s2077_s5 + $0x140] sm:$0xff] }
  0xeb   :  { %v214_v16 = vmax.f32 %v141_v13, 0.0  ;;  %v350_v13 = vld [vmem:[%s2074_s3 + $0x430] sm:$0xff] }
  0xec   :  { %v1243_v19 = vpack.c.bf16 %v353_v14, %v350_v13  ;;  %v688_v14 = vld [vmem:[%s2077_s5 + $0xd0] sm:$0xff] }
  0xed   :  { %441 = vmatprep.mubr.f32.mxu0 %v214_v16  ;;  %583 = vmatprep.mubr.f32.mxu1 %v214_v16  ;;  %v358_v16 = vld [vmem:[%s2074_s3 + $0x470] sm:$0xff] }
  0xee   :  { %442 = vmatmul.mubr.f32.vlgmr.msra.gmra.mrb[0].mxu0 %v213_v20  ;;  %584 = vmatmul.mubr.f32.vlgmr.msra.gmra.mrb[4].mxu1 %v213_v20  ;;  %v354_v20 = vld [vmem:[%s2074_s3 + $0x450] sm:$0xff] }
  0xef   :  { %1163 = vmatpush1.bf16.msra.mxu0 %v1162_v17  ;;  %1226 = vmatpush3.bf16.msra.mxu1 %v1225_v18  ;;  %v64_v17 = vrot.slane %v1743_v1, %v63_v7  ;;  %v1186_v18 = vpack.c.bf16 %v351_v12, %v348_v10  ;;  %v356_v1 = vld [vmem:[%s2074_s3 + $0x460] sm:$0xff]  ;;  %v1190_v25 = vpack.c.bf16 %v357_v22, %v354_v20  ;;  %v671_v12 = vld [vmem:[%s2077_s5 + $0x48] sm:$0xff]  ;;  %v672_v20 = vld [vmem:[%s2077_s5 + $0x50] sm:$0xff] }
  0xf0   :  { %1165 = vmatprep.subr.bf16.mxu0 %v1164_v21  ;;  %1227 = vmatprep.subr.bf16.mxu1 %v1312_v48  ;;  %v1188_v21 = vpack.c.bf16 %v358_v16, %v355_v15  ;;  %v1246_v26 = vpack.c.bf16 %v359_v23, %v356_v1  ;;  %v1264_v10 = vpack.c.bf16 %v687_v5, %v686_v4  ;;  %v689_v15 = vld [vmem:[%s2077_s5 + $0xd8] sm:$0xff]  ;;  %v704_v16 = vld [vmem:[%s2077_s5 + $0x150] sm:$0xff]  ;;  %v690_v1 = vld [vmem:[%s2077_s5 + $0xe0] sm:$0xff] }
  0xf1   :  { %512 = vmatprep.mubr.f32.mxu0 %v1311_v3  ;;  %1030 = vmatprep.mubr.msk.f32.mxu1 %vm1313_vm1, %v1311_v3  ;;  %v691_v23 = vld [vmem:[%s2077_s5 + $0xe8] sm:$0xff] }
  0xf3   :  { %1167 = vmatpush1.bf16.msra.mxu0 %v1166_v27  ;;  %1229 = vmatpush3.bf16.msra.mxu1 %v1228_v28  ;;  %v694_v28 = vld [vmem:[%s2077_s5 + $0x100] sm:$0xff] }
  0xf4   :  { %1169 = vmatprep.subr.bf16.mxu0 %v1168_v30  ;;  %1230 = vmatprep.subr.bf16.mxu1 %v1312_v48  ;;  %v678_v30 = vld [vmem:[%s2077_s5 + $0x80] sm:$0xff]  ;;  %v1281_v31 = vpack.c.bf16 %v695_v29, %v694_v28 }
  0xf5   :  { %v1248_v34 = vpack.c.bf16 %v679_v32, %v678_v30  ;;  %v674_v29 = vld [vmem:[%s2077_s5 + $0x60] sm:$0xff]  ;;  %v675_v30 = vld [vmem:[%s2077_s5 + $0x68] sm:$0xff]  ;;  %v708_v32 = vld [vmem:[%s2077_s5 + $0x170] sm:$0xff] }
  0xf7   :  { %1171 = vmatpush1.bf16.msra.mxu0 %v1170_v36  ;;  %1232 = vmatpush3.bf16.msra.mxu1 %v1231_v37  ;;  %v209_v49 = vpop.f32.mrb[2].mxu1  ;;  %v696_v36 = vld [vmem:[%s2077_s5 + $0x110] sm:$0xff]  ;;  %v697_v37 = vld [vmem:[%s2077_s5 + $0x118] sm:$0xff] }
  0xf8   :  { %1173 = vmatprep.subr.bf16.mxu0 %v1172_v39  ;;  %1233 = vmatprep.subr.bf16.mxu1 %v1312_v48  ;;  %v997_v54 = vpop.f32.mrb[3].mxu1  ;;  %v210_v24 = vadd.f32 %v209_v49, %v64_v17  ;;  %v1284_v39 = vpack.c.bf16 %v697_v37, %v696_v36  ;;  %v683_v49 = vld [vmem:[%s2077_s5 + $0xa8] sm:$0xff]  ;;  %v705_v17 = vld [vmem:[%s2077_s5 + $0x158] sm:$0xff] }
  0xf9   :  { %v684_v54 = vld [vmem:[%s2077_s5 + $0xb0] sm:$0xff]  ;;  %v1296_v22 = vpack.c.bf16 %v705_v17, %v704_v16  ;;  %v677_v37 = vld [vmem:[%s2077_s5 + $0x78] sm:$0xff] }
  0xfa   :  { %v215_v27 = vmax.f32 %v210_v24, 0.0  ;;  %v1260_v59 = vpack.c.bf16 %v685_v55, %v684_v54  ;;  %v706_v24 = vld [vmem:[%s2077_s5 + $0x160] sm:$0xff] }
  0xfb   :  { %1175 = vmatpush1.bf16.msra.mxu0 %v1174_v45  ;;  %1235 = vmatpush3.bf16.msra.mxu1 %v1234_v46  ;;  %v699_v45 = vld [vmem:[%s2077_s5 + $0x128] sm:$0xff]  ;;  %v682_v46 = vld [vmem:[%s2077_s5 + $0xa0] sm:$0xff] }
  0xfc   :  { %1177 = vmatprep.subr.bf16.mxu0 %v1176_v50  ;;  %1236 = vmatprep.subr.bf16.mxu1 %v1312_v48  ;;  %v1256_v50 = vpack.c.bf16 %v683_v49, %v682_v46  ;;  %v1287_v53 = vpack.c.bf16 %v699_v45, %v698_v44  ;;  %v365_v44 = vrot.slane %v360_v42, %v55_v0 }
  0xfd   :  { %v369_v45 = vrot.slane %v360_v42, %v59_v2 }
  0xff   :  { %1179 = vmatpush1.bf16.msra.mxu0 %v1178_v57  ;;  %1238 = vmatpush3.bf16.msra.mxu1 %v1237_v58  ;;  %v701_v57 = vld [vmem:[%s2077_s5 + $0x138] sm:$0xff]  ;;  %v1258_v58 = vpack.c.bf16 %v667_v52, %v666_v51 }
 0x100   :  { %1181 = vmatprep.subr.bf16.mxu0 %v1180_v60  ;;  %1239 = vmatprep.subr.bf16.mxu1 %v1312_v48  ;;  %v668_v60 = vld [vmem:[%s2077_s5 + $0x30] sm:$0xff]  ;;  %v1290_v62 = vpack.c.bf16 %v701_v57, %v700_v56 }
 0x103   :  { %1183 = vmatpush1.bf16.msra.mxu0 %v1182_v8  ;;  %1241 = vmatpush3.bf16.msra.mxu1 %v1240_v9  ;;  %v703_v8 = vld [vmem:[%s2077_s5 + $0x148] sm:$0xff]  ;;  %v1262_v9 = vpack.c.bf16 %v669_v61, %v668_v60 }
 0x104   :  { %1185 = vmatprep.subr.bf16.mxu0 %v1184_v11  ;;  %1242 = vmatprep.subr.bf16.mxu1 %v1312_v48  ;;  %v670_v11 = vld [vmem:[%s2077_s5 + $0x40] sm:$0xff]  ;;  %v1293_v13 = vpack.c.bf16 %v703_v8, %v702_v6 }
 0x107   :  { %1187 = vmatpush1.bf16.msra.mxu0 %v1186_v18  ;;  %1244 = vmatpush3.bf16.msra.mxu1 %v1243_v19  ;;  %v1266_v18 = vpack.c.bf16 %v671_v12, %v670_v11  ;;  %v1268_v19 = vpack.c.bf16 %v689_v15, %v688_v14 }
 0x108   :  { %1189 = vmatprep.subr.bf16.mxu0 %v1188_v21  ;;  %1245 = vmatprep.subr.bf16.mxu1 %v1312_v48  ;;  %v673_v21 = vld [vmem:[%s2077_s5 + $0x58] sm:$0xff] }
 0x10b   :  { %1191 = vmatpush1.bf16.msra.mxu0 %v1190_v25  ;;  %1247 = vmatpush3.bf16.msra.mxu1 %v1246_v26  ;;  %v707_v25 = vld [vmem:[%s2077_s5 + $0x168] sm:$0xff]  ;;  %v1270_v26 = vpack.c.bf16 %v673_v21, %v672_v20 }
 0x10c   :  { %1280 = vmatprep.subr.bf16.mxu0 %v1312_v48  ;;  %1249 = vmatprep.subr.bf16.mxu1 %v1248_v34  ;;  %v1299_v28 = vpack.c.bf16 %v707_v25, %v706_v24  ;;  %v692_v34 = vld [vmem:[%s2077_s5 + $0xf0] sm:$0xff] }
 0x10e   :  { %513 = vmatmul.mubr.f32.vlgmr.msra.gmra.mrb[0].mxu0 %v215_v27  ;;  %1031 = vmatmul.mubr.f32.vlgmr.msra.gmra.mrb[6].mxu1 %v215_v27  ;;  %v1272_v27 = vpack.c.bf16 %v691_v23, %v690_v1 }
 0x10f   :  { %1065 = vmatprep.mubr.msk.f32.mxu0 %vm1313_vm1, %v1311_v3  ;;  %v662_v3 = vld [vmem:[%s2077_s5] sm:$0xff]  ;;  %1282 = vmatpush3.bf16.msra.mxu0 %v1281_v31  ;;  %v1274_v31 = vpack.c.bf16 %v675_v30, %v674_v29 }
 0x110   :  { %v1250_v35 = vpack.c.bf16 %v663_v33, %v662_v3  ;;  %1283 = vmatprep.subr.bf16.mxu0 %v1312_v48  ;;  %v709_v3 = vld [vmem:[%s2077_s5 + $0x178] sm:$0xff] }
 0x111   :  { %v1302_v33 = vpack.c.bf16 %v709_v3, %v708_v32 }
 0x112   :  { %1251 = vmatpush3.bf16.msra.mxu1 %v1250_v35  ;;  %v693_v35 = vld [vmem:[%s2077_s5 + $0xf8] sm:$0xff] }
 0x113   :  { %1253 = vmatprep.subr.bf16.mxu1 %v1252_v43  ;;  %1285 = vmatpush3.bf16.msra.mxu0 %v1284_v39  ;;  %v1276_v36 = vpack.c.bf16 %v693_v35, %v692_v34  ;;  %v373_v43 = vrot.slane %v360_v42, %v63_v7 }
 0x114   :  { %1286 = vmatprep.subr.bf16.mxu0 %v1312_v48 }
 0x116   :  { %1255 = vmatpush3.bf16.msra.mxu1 %v1254_v47 }
 0x117   :  { %1257 = vmatprep.subr.bf16.mxu1 %v1256_v50  ;;  %1288 = vmatpush3.bf16.msra.mxu0 %v1287_v53 }
 0x118   :  { %1289 = vmatprep.subr.bf16.mxu0 %v1312_v48 }
 0x11a   :  { %1259 = vmatpush3.bf16.msra.mxu1 %v1258_v58 }
 0x11b   :  { %1261 = vmatprep.subr.bf16.mxu1 %v1260_v59  ;;  %1291 = vmatpush3.bf16.msra.mxu0 %v1290_v62 }
 0x11c   :  { %1292 = vmatprep.subr.bf16.mxu0 %v1312_v48 }
 0x11e   :  { %1263 = vmatpush3.bf16.msra.mxu1 %v1262_v9 }
 0x11f   :  { %1265 = vmatprep.subr.bf16.mxu1 %v1264_v10  ;;  %1294 = vmatpush3.bf16.msra.mxu0 %v1293_v13 }
 0x120   :  { %1295 = vmatprep.subr.bf16.mxu0 %v1312_v48 }
 0x122   :  { %1267 = vmatpush3.bf16.msra.mxu1 %v1266_v18 }
 0x123   :  { %1269 = vmatprep.subr.bf16.mxu1 %v1268_v19  ;;  %1297 = vmatpush3.bf16.msra.mxu0 %v1296_v22 }
 0x124   :  { %1298 = vmatprep.subr.bf16.mxu0 %v1312_v48 }
 0x126   :  { %1271 = vmatpush3.bf16.msra.mxu1 %v1270_v26 }
 0x127   :  { %1273 = vmatprep.subr.bf16.mxu1 %v1272_v27  ;;  %1300 = vmatpush3.bf16.msra.mxu0 %v1299_v28 }
 0x128   :  { %1301 = vmatprep.subr.bf16.mxu0 %v1312_v48  ;;  %v676_v48 = vld [vmem:[%s2077_s5 + $0x70] sm:$0xff] }
 0x129   :  { %v1278_v38 = vpack.c.bf16 %v677_v37, %v676_v48 }
 0x12a   :  { %1275 = vmatpush3.bf16.msra.mxu1 %v1274_v31 }
 0x12b   :  { %1303 = vmatpush3.bf16.msra.mxu0 %v1302_v33  ;;  %1277 = vmatprep.subr.bf16.mxu1 %v1276_v36 }
 0x12e   :  { %1279 = vmatpush3.bf16.msra.mxu1 %v1278_v38 }
 0x1c1   :  { %v907_v39 = vpop.f32.mrb[4].mxu1 }
 0x1c2   :  { %v908_v40 = vpop.f32.mrb[5].mxu1 }
 0x1c3   :  { %v909_v41 = vadd.f32 %v908_v40, %v907_v39 }
 0x1c5   :  { %v586_v46 = vadd.f32 %v909_v41, %v373_v43 }
 0x1e1   :  { %v514_v47 = vpop.f32.mrb[0].mxu0  ;;  %v655_v49 = vpop.f32.mrb[6].mxu1 }
 0x1e2   :  { %v1304_v50 = vadd.f32 %v514_v47, %v365_v44  ;;  %v656_v51 = vadd.f32 %v655_v49, %v586_v46  ;;  %v516_v52 = vpop.f32.mrb[1].mxu0  ;;  %v1032_v53 = vpop.f32.mrb[7].mxu1 }
 0x1e3   :  { %v1305_v54 = vadd.f32 %v516_v52, %v369_v45 }
 0x1e4   :  { %v661_v55 = vmax.f32 %v656_v51, 0.0  ;;  %v659_v57 = vmax.f32 %v1304_v50, 0.0 }
 0x1e5   :  { %v660_v56 = vmax.f32 %v1305_v54, 0.0 }
 0x1e6   :  { %1066 = vmatmul.mubr.f32.vlgmr.msra.gmra.mrb[2].mxu0 %v661_v55 }
 0x1e7   :  { %781 = vmatprep.mubr.f32.mxu1 %v660_v56 }
 0x1e8   :  { %782 = vmatmul.mubr.f32.vlgmr.msra.gmra.mrb[8].mxu1 %v659_v57 }
 0x2b9   :  { %v853_v7 = vpop.f32.mrb[2].mxu0 }
 0x2ba   :  { %v1067_v58 = vpop.f32.mrb[3].mxu0 }
 0x2bb   :  { %v959_v0 = vpop.f32.mrb[8].mxu1 }
 0x2bc   :  { %v960_v2 = vpop.f32.mrb[9].mxu1 }
 0x2bd   :  { %v961_v59 = vadd.f32 %v960_v2, %v959_v0 }
 0x2bf   :  { %v784_v60 = vadd.f32 %v961_v59, %v865_v63 }
 0x2c1   :  { %v854_v61 = vadd.f32 %v853_v7, %v784_v60 }
 0x2c3   :  { %858 = vst.msk [vmem:[%s2080_s7] sm:$0x3] %vm857_vm2, %v854_v61 }

// kernel: custom-call.65
= control target key start
LH: loop header
LB: loop body
LE: loop exit
PB: predicated region body
PF: predicated region fallthrough
CT: control target
= control target key end

     0   :  { %s645_s9 = smov 0   ;;  %s647_s10 = smov 0   ;;  %s795_s0 = inlined_call_operand.vmem [shape: f32[2,6,3], index: 0, kind: input, shape index: {}]   ;;  %s796_s1 = inlined_call_operand.vmem [shape: f32[2,6,3], index: 1, kind: output, shape index: {0}]   ;;  %s797_s2 = inlined_call_operand.vmem [shape: f32[2,3], index: 2, kind: output, shape index: {1}]  }
   0x1   :  { %s649_s11 = smov 0   ;;  %s651_s12 = smov 0  }
   0x2   :  { %s653_s13 = smov 0  }
   0x3 LB: > { %s28_s14 = sadd.s32 1, %s618_s12  ;;  %s500_s15 = sadd.s32 4294967295, %s622_s13   ;;  %s622_s13 = sphi %s653_s13, %s9_s13   ;;  %s618_s12 = sphi %s651_s12, %s804_s12   ;;  %s614_s11 = sphi %s649_s11, %s803_s11   ;;  %s610_s10 = sphi %s647_s10, %s802_s10   ;;  %s606_s9 = sphi %s645_s9, %s801_s9  }
   0x4   : > { %p30_p0 = scmp.ge.s32.totalorder %s28_s14, 2  ;;  %s33_s16 = ssub.s32 0, %s618_s12 }
   0x5   : > { %s502_s17 = smin.u32 %s618_s12, %s33_s16  ;;  %p57_p1 = scmp.ne.s32.totalorder %s610_s10, %s606_s9 }
   0x6   : > { %s806_s14 = smov (%p30_p0, %s28_s14), 0  ;;  %s35_s18 = sshrl.u32 %s502_s17, 3 }
   0x7   : > { %s39_s19 = ssub.s32 0, %s806_s14  ;;  %p58_p2 = scmp.eq.s32.totalorder %s500_s15, 1 }
   0x8   : > { %s503_s20 = smin.u32 %s39_s19, %s806_s14  ;;  %s47_s24 = sadd.s32 1, %s610_s10 }
   0x9   : > { %s41_s21 = sshrl.u32 %s503_s20, 3  ;;  %p680_p3 = por %p58_p2, %p57_p1 }
   0xa   : > { %s44_s23 = ssub.s32 %s35_s18, %s41_s21  ;;  %p505_p5 = scmp.ge.s32.totalorder %s622_s13, 2 }
   0xb   : > { %p45_p4 = scmp.eq.s32.totalorder %s44_s23, 0  ;;  %s82_s26 = sand.u32 (!%p505_p5), 1, %s622_s13  }
   0xc   : > { %80 = sbr.rel (%p505_p5) target bundleno = 19 (0x13), region = 16  ;;  %s507_s27 = sshll.u32 (!%p505_p5), %s618_s12, 3 }
   0xd   : > { %s686_s25 = scalar_select %p45_p4, %s610_s10, %s47_s24  }
   0xe   : > { %s506_s28 = sshll.u32 (!%p505_p5), %s82_s26, 3  ;;  %s88_s3 = scalar_lea.vmem (!%p505_p5), %s795_s0, %s507_s27 }
   0xf   : > { %v116_v0 = vld [vmem:[%s88_s3] sm:$0xff] (!%p505_p5)  ;;  %s84_s4 = scalar_lea.vmem (!%p505_p5), [#allocation0], %s506_s28 }
  0x10   : > { %117 = vst [vmem:[%s84_s4] sm:$0xff] (!%p505_p5), %v116_v0 }
  0x13 PF: > { %p508_p6 = scmp.ge.s32.totalorder %s622_s13, 1  ;;  %p122_p7 = scmp.lt.s32.totalorder %s622_s13, 3 }
  0x15   : > { %p123_p8 = pnand %p508_p6, %p122_p7 }
  0x17   : > { %126 = sbr.rel (%p123_p8) target bundleno = 330 (0x14a), region = 54 }
  0x1e   : > { %s129_s5 = sand.u32 1, %s500_s15   ;;  %s143_s6 = sand.u32 1, %s606_s9   ;;  %v628_v2 = vmov 0.0  }
  0x1f   : > { %s509_s7 = sshll.u32 %s129_s5, 3  ;;  %s697_s8 = sshll.u32 %s143_s6, 1 }
  0x20   : > { %s152_s16 = sand.u32 7, %s614_s11   ;;  %s131_s17 = scalar_lea.vmem [#allocation0], %s509_s7 }
  0x21   : > { %v154_v1 = vld [vmem:[%s131_s17] sm:$0xff]  ;;  %s700_s18 = scalar_lea.vmem [#allocation1], %s509_s7  ;;  %s703_s19 = scalar_lea.vmem [#allocation2], %s152_s16 }
  0x22   : > { %155 = vst [vmem:[%s700_s18] sm:$0xff] %v154_v1  ;;  %156 = vst [vmem:[%s703_s19] sm:$0x1] %v628_v2  ;;  %s145_s15 = scalar_lea.vmem [#allocation3], %s697_s8  ;;  %s707_s20 = smov 0  }
  0x23 LB: >> { %v164_v3 = vlaneseq  ;;  %v716_v5 = vstv %s626_s20  ;;  %s191_s9 = scalar_lea.vmem %s700_s18, %s626_s20 [#allocation1]  ;;  %s249_s21 = scalar_lea.vmem [#allocation4], %s626_s20  ;;  %v629_v59 = vmov 1.0   ;;  %s626_s20 = sphi %s707_s20, %s162_s20  }
  0x24   : >> { %s266_s23 = smov [#allocation4] }
  0x25   : >> { %v713_v4 = vshrl.u32 %v164_v3, 7  ;;  %v243_v48 = vand.u32 127, %v164_v3 }
  0x27   : >> { %vm168_vm0 = vcmp.gt.s32.totalorder %v713_v4, %v716_v5  ;;  %vm169_vm1 = vcmp.lt.s32.totalorder %v713_v4, 6  ;;  %v230_v4 = vmov %v713_v4  ;;  %vm734_vm12 = vcmp.eq.s32.totalorder %v243_v48, %v716_v5 }
  0x28   : >> { %vm170_vm2 = vmand %vm168_vm0, %vm169_vm1  ;;  %vm234_vm9 = vcmp.gt.s32.totalorder %v230_v4, %v716_v5  ;;  %vm235_vm10 = vcmp.lt.s32.totalorder %v230_v4, 6  ;;  %v269_v4 = vmov %v713_v4  ;;  %vm295_vm15 = vcmp.gt.s32.totalorder %v243_v48, %v716_v5 }
  0x29   : >> { %v163_v6 = vld [vmem:[%s700_s18] sm:$0xff]  ;;  %v192_v15 = vld [vmem:[%s191_s9] ss:$0 sm:$0xff]  ;;  %s227_s18 = smov %s700_s18  ;;  %vm236_vm11 = vmand %vm234_vm9, %vm235_vm10  ;;  %vm274_vm13 = vcmp.lt.s32.totalorder %v269_v4, 6  ;;  %v286_v4 = vmov %v713_v4 }
  0x2a   : >> { %v171_v7 = vsel %vm170_vm2, %v163_v6, 0.0  ;;  %v193_v16 = vand.u32 2147483647, %v192_v15  ;;  %vm218_vm8 = vcmp.lt.f32.partialorder %v192_v15, 0.0  ;;  %v231_v45 = vld [vmem:[%s227_s18] sm:$0xff]  ;;  %s265_s18 = smov %s700_s18  ;;  %vm303_vm14 = vcmp.ge.s32.totalorder %v286_v4, %v716_v5 }
  0x2b   : >> { %v172_v8 = vmul.f32 %v171_v7, %v171_v7  ;;  %v237_v49 = vsel %vm236_vm11, %v231_v45, 0.0  ;;  %v262_v60 = vld [vmem:[%s703_s19] ss:$0 sm:$0xff]  ;;  %vm304_vm0 = vmand %vm734_vm12, %vm303_vm14 }
  0x2c   : >> { %v194_v21 = vmax.f32 %v193_v16, 0.0  ;;  %v272_v63 = vld [vmem:[%s265_s18] sm:$0xff]  ;;  %s282_s18 = smov %s265_s18 }
  0x2d   : >> { %v173_v9 = vrot.slane %v172_v8, 4  ;;  %s307_s24 = scalar_lea.vmem %s282_s18, %s626_s20  ;;  %s162_s20 = sadd.s32 1, %s626_s20  }
  0x2e   : >> { %p159_p9 = scmp.ge.s32.totalorder %s162_s20, 3  }
  0x2f   : >> { %v174_v10 = vadd.f32 %v173_v9, %v172_v8  ;;  %s515_s26 = sshll.u32 (%p159_p9), %s614_s11, 3 }
  0x30   : > { %s332_s29 = scalar_lea.vmem (%p159_p9), %s796_s1, %s515_s26 }
  0x31   : >> { %v175_v11 = vrot.slane %v174_v10, 2 }
  0x33   : >> { %v176_v12 = vadd.f32 %v175_v11, %v174_v10 }
  0x35   : >> { %v177_v13 = vrot.slane %v176_v12, 1 }
  0x37   : >> { %v178_v14 = vadd.f32 %v177_v13, %v176_v12  ;;  %v293_v13 = vld [vmem:[%s282_s18] sm:$0xff] }
  0x39   : >> { %570 = vrsqrt.f32 %v178_v14  ;;  %vm181_vm3 = vcmp.eq.f32.partialorder %v178_v14, inf  ;;  %v184_v18 = vand.u32 2147483648, %v178_v14  ;;  %vm183_vm4 = vcmp.eq.f32.partialorder %v178_v14, 0.0 }
  0x43   : >> { %v571_v17 = vpop.eup %570 }
  0x44   : >> { %v180_v19 = vmul.f32 %v571_v17, %v178_v14 }
  0x46   : >> { %v182_v20 = vsel %vm181_vm3, %v178_v14, %v180_v19 }
  0x47   : >> { %v185_v22 = vsel %vm183_vm4, %v184_v18, %v182_v20 }
  0x48   : >> { %v195_v23 = vand.u32 2147483647, %v185_v22 }
  0x4a   : >> { %v196_v24 = vmax.f32 %v194_v21, %v195_v23 }
  0x4c   : >> { %572 = vrcp.f32 %v196_v24  ;;  %vm208_vm7 = vcmp.eq.f32.partialorder %v196_v24, 0.0 }
  0x56   : >> { %v573_v25 = vpop.eup %572 }
  0x57   : >> { %v198_v26 = vmul.f32 %v573_v25, %v193_v16  ;;  %v201_v27 = vmul.f32 0.0, %v573_v25  ;;  %v205_v28 = vmul.f32 %v573_v25, %v195_v23 }
  0x59   : >> { %v199_v29 = vmul.f32 %v198_v26, %v198_v26  ;;  %v202_v30 = vmul.f32 %v201_v27, %v201_v27  ;;  %v206_v31 = vmul.f32 %v205_v28, %v205_v28 }
  0x5b   : >> { %v203_v32 = vadd.f32 %v202_v30, %v199_v29 }
  0x5d   : >> { %v207_v33 = vadd.f32 %v206_v31, %v203_v32 }
  0x5f   : >> { %574 = vrsqrt.f32 %v207_v33  ;;  %vm211_vm5 = vcmp.eq.f32.partialorder %v207_v33, inf  ;;  %v214_v35 = vand.u32 2147483648, %v207_v33  ;;  %vm213_vm6 = vcmp.eq.f32.partialorder %v207_v33, 0.0 }
  0x69   : >> { %v575_v34 = vpop.eup %574 }
  0x6a   : >> { %v210_v36 = vmul.f32 %v575_v34, %v207_v33 }
  0x6c   : >> { %v212_v37 = vsel %vm211_vm5, %v207_v33, %v210_v36 }
  0x6d   : >> { %v215_v38 = vsel %vm213_vm6, %v214_v35, %v212_v37 }
  0x6e   : >> { %v216_v39 = vmul.f32 %v215_v38, %v196_v24 }
  0x70   : >> { %v217_v40 = vsel %vm208_vm7, 0.0, %v216_v39 }
  0x71   : >> { %v219_v41 = vxor.u32 2147483648, %v217_v40 }
  0x73   : >> { %v220_v42 = vsel %vm218_vm8, %v217_v40, %v219_v41 }
  0x74   : >> { %v726_v43 = vsel %vm183_vm4, %v192_v15, %v220_v42  ;;  %576 = vrcp.f32 %v220_v42  ;;  %v221_v46 = vsub.f32 %v220_v42, %v192_v15 }
  0x75   : >> { %v226_v44 = vsub.f32 %v192_v15, %v726_v43 }
  0x77   : >> { %578 = vrcp.f32 %v226_v44 }
  0x7e   : >> { %v577_v47 = vpop.eup %576 }
  0x7f   : >> { %v223_v50 = vmul.f32 %v577_v47, %v221_v46 }
  0x81   : >> { %v579_v51 = vpop.eup %578  ;;  %v225_v55 = vsel %vm183_vm4, 0.0, %v223_v50 }
  0x82   : >> { %v239_v52 = vmul.f32 %v579_v51, %v237_v49  ;;  %v255_v57 = vsel %vm734_vm12, %v225_v55, 0.0 }
  0x84   : >> { %v240_v54 = vsel %vm183_vm4, 0.0, %v239_v52 }
  0x85   : >> { %v245_v56 = vsel %vm734_vm12, %v240_v54, 0.0 }
  0x86   : >> { %246 = vadd.xlane.f32.xlu0 %v245_v56 }
  0x8a   : >> { %256 = vadd.xlane.f32.xlu0 %v255_v57 }
 0x113   : >> { %v247_v58 = vpop.xlane.xlu0 %246 }
 0x114   : >> { %248 = vst [vmem:[#allocation4] sm:$0xff] %v247_v58 }
 0x115   : >> { %250 = vst [vmem:[%s249_s21] sm:$0x1] %v629_v59 }
 0x117   : >> { %v257_v61 = vpop.xlane.xlu0 %256 }
 0x118   : >> { %v263_v62 = vsel %vm734_vm12, %v257_v61, %v262_v60 }
 0x119   : >> { %264 = vst [vmem:[%s703_s19] sm:$0x1] %v263_v62 }
 0x11c   : >> { %v271_v0 = vld [vmem:[%s266_s23] sm:$0xff]  ;;  %s283_s23 = smov %s266_s23 }
 0x11d   : >> { %v273_v1 = vmul.f32 %v272_v63, %v271_v0  ;;  %v291_v12 = vld [vmem:[%s283_s23] sm:$0xff] }
 0x11f   : >> { %v275_v2 = vsel %vm274_vm13, %v273_v1, 0.0 }
 0x120   : >> { %v276_v3 = vrot.slane %v275_v2, 4  ;;  %v318_v4 = vld [vmem:[#allocation2] sm:$0x3] (%p159_p9) }
 0x121   : > { %320 = vst [vmem:[%s145_s15] sm:$0x3] (%p159_p9), %v318_v4 }
 0x122   : >> { %v277_v6 = vadd.f32 %v276_v3, %v275_v2 }
 0x124   : >> { %v278_v7 = vrot.slane %v277_v6, 2 }
 0x126   : >> { %v279_v8 = vadd.f32 %v278_v7, %v277_v6 }
 0x128   : >> { %v280_v9 = vrot.slane %v279_v8, 1 }
 0x12a   : >> { %v281_v10 = vadd.f32 %v280_v9, %v279_v8 }
 0x12c   : >> { %v287_v11 = vmul.f32 %v281_v10, %v257_v61 }
 0x12e   : >> { %v292_v14 = vmul.f32 %v291_v12, %v287_v11 }
 0x130   : >> { %v296_v15 = vsub.f32 %v293_v13, %v292_v14 }
 0x132   : >> { %v297_v16 = vsel %vm295_vm15, %v296_v15, %v293_v13 }
 0x133   : >> { %v305_v17 = vsel %vm304_vm0, %v291_v12, %v297_v16 }
 0x134   : >> { %306 = vst [vmem:[%s282_s18] sm:$0xff] %v305_v17 }
 0x137   : > { %161 = sbr.rel (!%p159_p9) target bundleno = 35 (0x23), region = 175 }
 0x13b   : >> { %v308_v18 = vld [vmem:[%s307_s24] ss:$0 sm:$0xff] }
 0x13c   : >> { %v313_v19 = vsel %vm734_vm12, %v726_v43, %v308_v18 }
 0x13d   : >> { %314 = vst [vmem:[%s307_s24] sm:$0x1] %v313_v19 }
 0x13e   : > { %p368_p10 = scmp.lt.s32.totalorder (%p680_p3), %s614_s11, 0  ;;  %s369_s30 = ssub.s32 (%p680_p3), 0, %s614_s11  ;;  %v391_v20 = vld [vmem:[%s145_s15] sm:$0x3] (%p680_p3) }
 0x13f   : > { %367 = sbr.rel (!%p680_p3) target bundleno = 330 (0x14a), region = 99  ;;  %s516_s3 = smin.u32 (%p680_p3), %s614_s11, %s369_s30 }
 0x140   : > { %s371_s4 = sshrl.u32 (%p680_p3), %s516_s3, 3 }
 0x141   : > { %s372_s5 = ssub.s32 (%p680_p3), 0, %s371_s4 }
 0x144   : > { %v360_v5 = vld [vmem:[%s700_s18] sm:$0xff] }
 0x145   : > { %361 = vst [vmem:[%s332_s29] sm:$0xff] %v360_v5 }
 0x146   : > { %s808_s5 = smov (!%p368_p10, %s372_s5), %s371_s4 }
 0x147   : > { %s517_s6 = sshll.u32 %s808_s5, 1 }
 0x148   : > { %s375_s17 = scalar_lea.vmem %s797_s2, %s517_s6 }
 0x149   : > { %392 = vst [vmem:[%s375_s17] sm:$0x3] %v391_v20 }
 0x14a PF: > { %s9_s13 = sadd.s32 1, %s622_s13   ;;  %s801_s9 = smov %s610_s10 }
 0x14b   : > { %p6_p11 = scmp.ge.s32.totalorder %s9_s13, 4   ;;  %s802_s10 = smov %s686_s25 }
 0x14c   : > { %s803_s11 = smov %s618_s12  ;;  %s804_s12 = smov %s806_s14 }
 0x14d   :  { %8 = sbr.rel (!%p6_p11) target bundleno = 3 (0x3), region = 186 }

// kernel: custom-call.66
= control target key start
LH: loop header
LB: loop body
LE: loop exit
PB: predicated region body
PF: predicated region fallthrough
CT: control target
= control target key end

     0   :  { %s236_s6 = smov 0   ;;  %s263_s0 = inlined_call_operand.vmem [shape: f32[2,3,3], index: 0, kind: input, shape index: {}]   ;;  %s264_s1 = inlined_call_operand.vmem [shape: f32[2,3,3], index: 1, kind: output, shape index: {}]  }
   0x1 LB: > { %s198_s7 = sadd.s32 4294967295, %s224_s6   ;;  %p200_p0 = scmp.ge.s32.totalorder %s224_s6, 2  ;;  %s224_s6 = sphi %s236_s6, %s7_s6  }
   0x2   : > { %s23_s8 = sand.u32 (!%p200_p0), 1, %s224_s6   ;;  %s202_s9 = sshll.u32 (!%p200_p0), %s224_s6, 2 }
   0x3   : > { %21 = sbr.rel (%p200_p0) target bundleno = 10 (0xa), region = 16  ;;  %s201_s10 = sshll.u32 (!%p200_p0), %s23_s8, 2 }
   0x4   : > { %s27_s13 = scalar_lea.vmem (!%p200_p0), %s263_s0, %s202_s9  ;;  %s25_s14 = scalar_lea.vmem (!%p200_p0), [#allocation1], %s201_s10 }
   0x5   : > { %v43_v0 = vld [vmem:[%s27_s13] sm:$0xf] (!%p200_p0) }
   0x6   : > { %44 = vst [vmem:[%s25_s14] sm:$0xf] (!%p200_p0), %v43_v0 }
   0xa PF: > { %p203_p1 = scmp.ge.s32.totalorder %s224_s6, 1  ;;  %p60_p2 = scmp.lt.s32.totalorder %s224_s6, 3 }
   0xc   : > { %p61_p3 = pnand %p203_p1, %p60_p2 }
   0xd   : > { %s252_s15 = sand.u32 (!%p61_p3), 1, %s198_s7   ;;  %v82_v1 = vlaneseq (!%p61_p3)  ;;  %vm96_vm1 = vcmask (!%p61_p3), 23552   ;;  %s207_s19 = sshll.u32 (!%p61_p3), %s198_s7, 2 }
   0xe   : > { %64 = sbr.rel (%p61_p3) target bundleno = 334 (0x14e), region = 50  ;;  %s204_s16 = sshll.u32 (!%p61_p3), %s252_s15, 2 }
   0xf   : > { %s73_s17 = scalar_lea.vmem (!%p61_p3), [#allocation1], %s204_s16  ;;  %v83_v3 = vand.u32 (!%p61_p3), 127, %v82_v1  ;;  %v85_v4 = vshrl.u32 (!%p61_p3), %v82_v1, 7  ;;  %s77_s18 = scalar_lea.vmem (!%p61_p3), [#allocation3], %s204_s16 }
  0x10   : > { %v80_v2 = vld [vmem:[%s73_s17] sm:$0xf] (!%p61_p3)  ;;  %s128_s22 = scalar_lea.vmem (!%p61_p3), %s264_s1, %s207_s19 }
  0x11   : > { %81 = vst [vmem:[#allocation0] sm:$0xf] (!%p61_p3), %v80_v2  ;;  %vm91_vm0 = vcmp.eq.s32.totalorder (!%p61_p3), %v83_v3, 0  ;;  %vm87_vm2 = vcmp.eq.s32.totalorder (!%p61_p3), %v83_v3, %v85_v4  ;;  %vm100_vm3 = vcmp.eq.s32.totalorder (!%p61_p3), %v83_v3, 1  ;;  %vm111_vm4 = vcmp.eq.s32.totalorder (!%p61_p3), %v83_v3, 2 }
  0x18   : > { %v88_v5 = vld [vmem:[#allocation0] sm:$0xff] }
  0x19   : > { %v95_v6 = vld [vmem:[#allocation0 + $0x1] ss:$0 sm:$0xff]  ;;  %v92_v7 = vsel %vm91_vm0, %v88_v5, 1.0  ;;  %v106_v11 = vld [vmem:[#allocation0 + $0x2] ss:$0 sm:$0xff] }
  0x1a   : > { %v97_v8 = vsel %vm96_vm1, %v95_v6, 0.0  ;;  %v93_v9 = vsel %vm87_vm2, %v92_v7, 0.0  ;;  %v108_v12 = vsel %vm96_vm1, %v106_v11, 0.0 }
  0x1b   : > { %v101_v10 = vmul.f32 %v97_v8, %v93_v9 }
  0x1d   : > { %102 = vadd.xlane.f32.xlu0 %v101_v10 }
  0xaa   : > { %v103_v13 = vpop.xlane.xlu0 %102 }
  0xab   : > { %v104_v14 = vsel %vm100_vm3, %v103_v13, %v93_v9 }
  0xac   : > { %v112_v15 = vmul.f32 %v108_v12, %v104_v14 }
  0xae   : > { %113 = vadd.xlane.f32.xlu0 %v112_v15 }
 0x13b   : > { %v114_v16 = vpop.xlane.xlu0 %113 }
 0x13c   : > { %v115_v17 = vsel %vm111_vm4, %v114_v16, %v104_v14 }
 0x13d   : > { %116 = vst [vmem:[#allocation2] sm:$0xff] %v115_v17 }
 0x144   : > { %v120_v18 = vld [vmem:[#allocation2] sm:$0xf] }
 0x145   : > { %122 = vst [vmem:[%s77_s18] sm:$0xf] %v120_v18 }
 0x14c   : > { %v144_v19 = vld [vmem:[%s77_s18] sm:$0xf] }
 0x14d   : > { %145 = vst [vmem:[%s128_s22] sm:$0xf] %v144_v19 }
 0x14e PF: > { %s7_s6 = sadd.s32 1, %s224_s6  }
 0x14f   : > { %p4_p4 = scmp.ge.s32.totalorder %s7_s6, 4  }
 0x151   :  { %6 = sbr.rel (!%p4_p4) target bundleno = 1 (0x1), region = 112 }

// kernel: custom-call.58
= control target key start
LH: loop header
LB: loop body
LE: loop exit
PB: predicated region body
PF: predicated region fallthrough
CT: control target
= control target key end

     0   :  { %s6_s0 = inlined_call_operand.hbm [shape: pred[2], index: 0, kind: output, shape index: {}]  }

// kernel: custom-call.63
= control target key start
LH: loop header
LB: loop body
LE: loop exit
PB: predicated region body
PF: predicated region fallthrough
CT: control target
= control target key end

     0   :  { %s343_s6 = smov 0   ;;  %s345_s7 = smov 0   ;;  %s390_s0 = inlined_call_operand.vmem [shape: f32[2,3,3], index: 0, kind: input, shape index: {}]   ;;  %s391_s1 = inlined_call_operand.vmem [shape: f32[2,3,3], index: 1, kind: output, shape index: {}]  }
   0x1   :  { %s347_s8 = smov 0  }
   0x2 LB: > { %s265_s9 = sadd.s32 4294967295, %s330_s8   ;;  %s26_s10 = sadd.s32 1, %s326_s7  ;;  %s330_s8 = sphi %s347_s8, %s7_s8   ;;  %s326_s7 = sphi %s345_s7, %s393_s7   ;;  %s322_s6 = sphi %s343_s6, %s392_s6  }
   0x3   : > { %p28_p0 = scmp.ge.s32.totalorder %s26_s10, 2  ;;  %p267_p1 = scmp.ge.s32.totalorder %s330_s8, 2 }
   0x4   : > { %s42_s11 = sand.u32 (!%p267_p1), 1, %s330_s8   ;;  %s269_s12 = sshll.u32 (!%p267_p1), %s326_s7, 2 }
   0x5   : > { %s395_s10 = smov (%p28_p0, %s26_s10), 0  ;;  %40 = sbr.rel (%p267_p1) target bundleno = 12 (0xc), region = 16 }
   0x6   : > { %s268_s13 = sshll.u32 (!%p267_p1), %s42_s11, 2  ;;  %s48_s16 = scalar_lea.vmem (!%p267_p1), %s390_s0, %s269_s12 }
   0x7   : > { %v64_v0 = vld [vmem:[%s48_s16] sm:$0xf] (!%p267_p1)  ;;  %s44_s17 = scalar_lea.vmem (!%p267_p1), [#allocation1], %s268_s13 }
   0x8   : > { %65 = vst [vmem:[%s44_s17] sm:$0xf] (!%p267_p1), %v64_v0 }
   0xc PF: > { %p270_p2 = scmp.ge.s32.totalorder %s330_s8, 1  ;;  %p81_p3 = scmp.lt.s32.totalorder %s330_s8, 3 }
   0xe   : > { %p82_p4 = pnand %p270_p2, %p81_p3 }
   0xf   : > { %v332_v1 = vmov (!%p82_p4), 0.0   ;;  %s370_s18 = sand.u32 (!%p82_p4), 1, %s265_s9   ;;  %vm104_vm0 = vcmask (!%p82_p4), 7168   ;;  %vm122_vm1 = vcmask (!%p82_p4), 15368   ;;  %vm139_vm2 = vcmask (!%p82_p4), 1047553   ;;  %s274_s22 = sshll.u32 (!%p82_p4), %s322_s6, 2 }
  0x10   : > { %85 = sbr.rel (%p82_p4) target bundleno = 541 (0x21d), region = 50  ;;  %103 = vst [vmem:[#allocation2] sm:$0xff] (!%p82_p4), %v332_v1  ;;  %s271_s19 = sshll.u32 (!%p82_p4), %s370_s18, 2  ;;  %vm140_vm3 = vmand (!%p82_p4), %vm122_vm1, %vm139_vm2  ;;  %vm144_vm4 = vcmask (!%p82_p4), 23568   ;;  %vm161_vm5 = vcmask (!%p82_p4), 1047554  }
  0x11   : > { %s94_s20 = scalar_lea.vmem (!%p82_p4), [#allocation1], %s271_s19  ;;  %vm162_vm6 = vmand (!%p82_p4), %vm144_vm4, %vm161_vm5  ;;  %s98_s21 = scalar_lea.vmem (!%p82_p4), [#allocation3], %s271_s19 }
  0x12   : > { %v101_v5 = vld [vmem:[%s94_s20] sm:$0xf] (!%p82_p4)  ;;  %s179_s25 = scalar_lea.vmem (!%p82_p4), %s391_s1, %s274_s22 }
  0x13   : > { %102 = vst [vmem:[#allocation0] sm:$0xf] (!%p82_p4), %v101_v5 }
  0x17   : > { %v105_v2 = vld [vmem:[#allocation2] ss:$0 sm:$0xff] }
  0x18   : > { %v107_v3 = vmul.f32 %v105_v2, %v105_v2  ;;  %v114_v4 = vmul.f32 0.0, %v105_v2 }
  0x1a   : > { %108 = vadd.xlane.f32.xlu0 %v107_v3  ;;  %v106_v6 = vld [vmem:[#allocation0] ss:$0 sm:$0xff]  ;;  %v126_v18 = vld [vmem:[#allocation0 + $0x1] ss:$0 sm:$0xff]  ;;  %v148_v30 = vld [vmem:[#allocation0 + $0x2] ss:$0 sm:$0xff] }
  0x1b   : > { %v112_v10 = vld [vmem:[#allocation0] sm:$0xff] }
  0x1e   : > { %115 = vadd.xlane.f32.xlu0 %v114_v4 }
  0xa7   : > { %v109_v7 = vpop.xlane.xlu0 %108 }
  0xa8   : > { %v110_v8 = vsub.f32 %v106_v6, %v109_v7 }
  0xaa   : > { %302 = vrsqrt.f32 %v110_v8 }
  0xab   : > { %v116_v9 = vpop.xlane.xlu0 %115 }
  0xac   : > { %v117_v11 = vsub.f32 %v112_v10, %v116_v9 }
  0xb4   : > { %v303_v12 = vpop.eup %302 }
  0xb5   : > { %v118_v13 = vmul.f32 %v303_v12, %v117_v11 }
  0xb7   : > { %v119_v14 = vsel %vm104_vm0, %v118_v13, 0.0 }
  0xb8   : > { %121 = vst [vmem:[#allocation2] sm:$0xff] %v119_v14 }
  0xbf   : > { %v124_v15 = vld [vmem:[#allocation2 + $0x1] ss:$0 sm:$0xff] }
  0xc0   : > { %v127_v16 = vmul.f32 %v124_v15, %v124_v15  ;;  %v134_v17 = vmul.f32 %v124_v15, %v119_v14 }
  0xc2   : > { %128 = vadd.xlane.f32.xlu1 %v127_v16 }
  0xc6   : > { %135 = vadd.xlane.f32.xlu1 %v134_v17 }
 0x14f   : > { %v129_v19 = vpop.xlane.xlu1 %128 }
 0x150   : > { %v130_v20 = vsub.f32 %v126_v18, %v129_v19 }
 0x152   : > { %304 = vrsqrt.f32 %v130_v20 }
 0x153   : > { %v136_v21 = vpop.xlane.xlu1 %135 }
 0x154   : > { %v137_v22 = vsub.f32 %v112_v10, %v136_v21 }
 0x15c   : > { %v305_v23 = vpop.eup %304 }
 0x15d   : > { %v138_v24 = vmul.f32 %v305_v23, %v137_v22 }
 0x15f   : > { %v141_v25 = vsel %vm140_vm3, %v138_v24, 0.0 }
 0x160   : > { %v142_v26 = vadd.f32 %v141_v25, %v119_v14 }
 0x162   : > { %143 = vst [vmem:[#allocation2] sm:$0xff] %v142_v26 }
 0x169   : > { %v146_v27 = vld [vmem:[#allocation2 + $0x2] ss:$0 sm:$0xff] }
 0x16a   : > { %v156_v28 = vmul.f32 %v146_v27, %v142_v26  ;;  %v149_v29 = vmul.f32 %v146_v27, %v146_v27 }
 0x16c   : > { %157 = vadd.xlane.f32.xlu1 %v156_v28  ;;  %150 = vadd.xlane.f32.xlu0 %v149_v29 }
 0x1f9   : > { %v151_v31 = vpop.xlane.xlu0 %150  ;;  %v158_v33 = vpop.xlane.xlu1 %157 }
 0x1fa   : > { %v152_v32 = vsub.f32 %v148_v30, %v151_v31  ;;  %v159_v34 = vsub.f32 %v112_v10, %v158_v33 }
 0x1fc   : > { %306 = vrsqrt.f32 %v152_v32 }
 0x206   : > { %v307_v35 = vpop.eup %306 }
 0x207   : > { %v160_v36 = vmul.f32 %v307_v35, %v159_v34 }
 0x209   : > { %v163_v37 = vsel %vm162_vm6, %v160_v36, 0.0 }
 0x20a   : > { %v164_v38 = vadd.f32 %v163_v37, %v142_v26 }
 0x20c   : > { %165 = vst [vmem:[#allocation2] sm:$0xff] %v164_v38 }
 0x213   : > { %v169_v39 = vld [vmem:[#allocation2] sm:$0xf] }
 0x214   : > { %171 = vst [vmem:[%s98_s21] sm:$0xf] %v169_v39 }
 0x21b   : > { %v195_v40 = vld [vmem:[%s98_s21] sm:$0xf] }
 0x21c   : > { %196 = vst [vmem:[%s179_s25] sm:$0xf] %v195_v40 }
 0x21d PF: > { %s7_s8 = sadd.s32 1, %s330_s8   ;;  %s392_s6 = smov %s326_s7 }
 0x21e   : > { %p4_p5 = scmp.ge.s32.totalorder %s7_s8, 4   ;;  %s393_s7 = smov %s395_s10 }
 0x220   :  { %6 = sbr.rel (!%p4_p5) target bundleno = 2 (0x2), region = 114 }

// kernel: custom-call.64
= control target key start
LH: loop header
LB: loop body
LE: loop exit
PB: predicated region body
PF: predicated region fallthrough
CT: control target
= control target key end

     0   :  { %s343_s6 = smov 0   ;;  %s345_s7 = smov 0   ;;  %s390_s0 = inlined_call_operand.vmem [shape: f32[2,1,3,3], index: 0, kind: input, shape index: {}]   ;;  %s391_s1 = inlined_call_operand.vmem [shape: f32[2,1,3,3], index: 1, kind: output, shape index: {}]  }
   0x1   :  { %s347_s8 = smov 0  }
   0x2 LB: > { %s269_s9 = sadd.s32 4294967295, %s330_s8   ;;  %s33_s10 = sadd.s32 1, %s326_s7  ;;  %s330_s8 = sphi %s347_s8, %s7_s8   ;;  %s326_s7 = sphi %s345_s7, %s393_s7   ;;  %s322_s6 = sphi %s343_s6, %s392_s6  }
   0x3   : > { %p35_p0 = scmp.ge.s32.totalorder %s33_s10, 2  ;;  %p271_p1 = scmp.ge.s32.totalorder %s330_s8, 2 }
   0x4   : > { %s49_s11 = sand.u32 (!%p271_p1), 1, %s330_s8   ;;  %s273_s12 = sshll.u32 (!%p271_p1), %s326_s7, 2 }
   0x5   : > { %s395_s10 = smov (%p35_p0, %s33_s10), 0  ;;  %47 = sbr.rel (%p271_p1) target bundleno = 12 (0xc), region = 16 }
   0x6   : > { %s272_s13 = sshll.u32 (!%p271_p1), %s49_s11, 2  ;;  %s56_s16 = scalar_lea.vmem (!%p271_p1), %s390_s0, %s273_s12 }
   0x7   : > { %v72_v0 = vld [vmem:[%s56_s16] sm:$0xf] (!%p271_p1)  ;;  %s51_s17 = scalar_lea.vmem (!%p271_p1), [#allocation1], %s272_s13 }
   0x8   : > { %73 = vst [vmem:[%s51_s17] sm:$0xf] (!%p271_p1), %v72_v0 }
   0xc PF: > { %p274_p2 = scmp.ge.s32.totalorder %s330_s8, 1  ;;  %p89_p3 = scmp.lt.s32.totalorder %s330_s8, 3 }
   0xe   : > { %p90_p4 = pnand %p274_p2, %p89_p3 }
  0x10   : > { %93 = sbr.rel (%p90_p4) target bundleno = 511 (0x1ff), region = 50 }
  0x17   : > { %s370_s18 = sand.u32 1, %s269_s9   ;;  %v111_v1 = vlaneseq  ;;  %v332_v11 = vmov -1.0   ;;  %s278_s22 = sshll.u32 %s322_s6, 2 }
  0x18   : > { %s275_s19 = sshll.u32 %s370_s18, 2  ;;  %s178_s25 = scalar_lea.vmem %s391_s1, %s278_s22 }
  0x19   : > { %s102_s20 = scalar_lea.vmem [#allocation1], %s275_s19  ;;  %v112_v3 = vand.u32 127, %v111_v1  ;;  %v115_v4 = vshrl.u32 %v111_v1, 7  ;;  %s106_s21 = scalar_lea.vmem [#allocation3], %s275_s19 }
  0x1a   : > { %v109_v2 = vld [vmem:[%s102_s20] sm:$0xf] }
  0x1b   : > { %110 = vst [vmem:[#allocation0] sm:$0xf] %v109_v2  ;;  %vm113_vm0 = vcmp.lt.s32.totalorder %v112_v3, 3  ;;  %vm122_vm1 = vcmp.ge.s32.totalorder %v115_v4, %v112_v3  ;;  %vm117_vm2 = vcmp.eq.s32.totalorder %v115_v4, %v112_v3  ;;  %vm136_vm4 = vcmp.eq.s32.totalorder %v112_v3, 0 }
  0x1c   : > { %vm123_vm3 = vmand %vm122_vm1, %vm113_vm0  ;;  %vm133_vm5 = vcmp.eq.s32.totalorder %v112_v3, %v115_v4  ;;  %v137_v12 = vsel %vm136_vm4, 1.0, %v332_v11  ;;  %vm144_vm6 = vcmp.eq.s32.totalorder %v112_v3, 1  ;;  %vm154_vm7 = vcmp.eq.s32.totalorder %v112_v3, 2 }
  0x1d   : > { %v138_v13 = vsel %vm133_vm5, %v137_v12, 0.0 }
  0x22   : > { %v118_v5 = vld [vmem:[#allocation0] sm:$0xff] }
  0x23   : > { %v119_v6 = vsel %vm117_vm2, %v118_v5, 0.0  ;;  %v124_v7 = vsel %vm123_vm3, %v118_v5, 0.0 }
  0x24   : > { %120 = vadd.xlane.f32.xlu0 %v119_v6 }
  0xb1   : > { %v121_v8 = vpop.xlane.xlu0 %120 }
  0xb2   : > { %306 = vrcp.f32 %v121_v8  ;;  %vm161_vm8 = vweird.f32 %v121_v8 }
  0xbc   : > { %v307_v9 = vpop.eup %306 }
  0xbd   : > { %v126_v10 = vmul.f32 %v307_v9, %v124_v7 }
  0xbf   : > { %127 = vst [vmem:[#allocation4] sm:$0xff] %v126_v10 }
  0xc6   : > { %v140_v14 = vld [vmem:[#allocation4 + $0x1] ss:$0 sm:$0xff]  ;;  %v150_v17 = vld [vmem:[#allocation4 + $0x2] ss:$0 sm:$0xff] }
  0xc7   : > { %v141_v15 = vxor.u32 2147483648, %v140_v14  ;;  %v151_v19 = vxor.u32 2147483648, %v150_v17 }
  0xc9   : > { %v145_v16 = vmul.f32 %v141_v15, %v138_v13 }
  0xcb   : > { %146 = vadd.xlane.f32.xlu0 %v145_v16 }
 0x158   : > { %v147_v18 = vpop.xlane.xlu0 %146 }
 0x159   : > { %v148_v20 = vsel %vm144_vm6, %v147_v18, %v138_v13 }
 0x15a   : > { %v155_v21 = vmul.f32 %v151_v19, %v148_v20 }
 0x15c   : > { %156 = vadd.xlane.f32.xlu1 %v155_v21 }
 0x1e9   : > { %v157_v22 = vpop.xlane.xlu1 %156 }
 0x1ea   : > { %v158_v23 = vsel %vm154_vm7, %v157_v22, %v148_v20 }
 0x1eb   : > { %v160_v24 = vmul.f32 %v307_v9, %v158_v23 }
 0x1ed   : > { %v162_v25 = vsel %vm161_vm8, %v158_v23, %v160_v24 }
 0x1ee   : > { %163 = vst [vmem:[#allocation2] sm:$0xff] %v162_v25 }
 0x1f5   : > { %v167_v26 = vld [vmem:[#allocation2] sm:$0xf] }
 0x1f6   : > { %169 = vst [vmem:[%s106_s21] sm:$0xf] %v167_v26 }
 0x1fd   : > { %v194_v27 = vld [vmem:[%s106_s21] sm:$0xf] }
 0x1fe   : > { %195 = vst [vmem:[%s178_s25] sm:$0xf] %v194_v27 }
 0x1ff PF: > { %s7_s8 = sadd.s32 1, %s330_s8   ;;  %s392_s6 = smov %s326_s7 }
 0x200   : > { %p4_p5 = scmp.ge.s32.totalorder %s7_s8, 4   ;;  %s393_s7 = smov %s395_s10 }
 0x202   :  { %6 = sbr.rel (!%p4_p5) target bundleno = 2 (0x2), region = 112 }

// kernel: custom-call.22
= control target key start
LH: loop header
LB: loop body
LE: loop exit
PB: predicated region body
PF: predicated region fallthrough
CT: control target
= control target key end

     0   :  { %s1704_s30 = smov 0   ;;  %s1706_s10 = smov 0   ;;  %s2030_s0 = inlined_call_operand.vmem [shape: f32[2,2,2], index: 0, kind: input, shape index: {}]   ;;  %s2031_s1 = inlined_call_operand.vmem [shape: f32[2,2,2], index: 1, kind: input, shape index: {}]   ;;  %s2032_s2 = inlined_call_operand.vmem [shape: f32[2,2,2], index: 2, kind: input, shape index: {}]   ;;  %s2033_s3 = inlined_call_operand.vmem [shape: f32[2,2,2], index: 3, kind: input, shape index: {}]   ;;  %s2034_s4 = inlined_call_operand.vmem [shape: f32[2,2], index: 4, kind: output, shape index: {0}]   ;;  %s2035_s5 = inlined_call_operand.vmem [shape: f32[2,2], index: 5, kind: output, shape index: {1}]   ;;  %s2036_s6 = inlined_call_operand.vmem [shape: f32[2,2,2], index: 6, kind: output, shape index: {2}]   ;;  %s2037_s7 = inlined_call_operand.vmem [shape: f32[2,2,2], index: 7, kind: output, shape index: {3}]   ;;  %s2038_s8 = inlined_call_operand.vmem [shape: f32[2,2,2], index: 8, kind: output, shape index: {4}]   ;;  %s2039_s9 = inlined_call_operand.vmem [shape: f32[2,2,2], index: 9, kind: output, shape index: {5}]  }
   0x1   :  { %s1708_s11 = smov 0  }
   0x2 LB: > { %s1720_s12 = sadd.s32 4294967295, %s1641_s11   ;;  %s1723_s13 = sadd.s32 1, %s1641_s11   ;;  %s1641_s11 = sphi %s1708_s11, %s2058_s11   ;;  %s1637_s10 = sphi %s1706_s10, %s2057_s10   ;;  %s1633_s30 = sphi %s1704_s30, %s2056_s30  }
   0x3   : > { %s20_s14 = sshrl.u32 %s1641_s11, 3  ;;  %s21_s15 = sshrl.u32 %s1723_s13, 3 }
   0x4   : > { %s22_s16 = ssub.s32 %s20_s14, %s21_s15  ;;  %s25_s17 = sadd.s32 1, %s1637_s10 }
   0x5   : > { %p23_p0 = scmp.eq.s32.totalorder %s22_s16, 0  ;;  %p35_p1 = scmp.ne.s32.totalorder %s1637_s10, %s1633_s30 }
   0x6   : > { %p36_p2 = scmp.eq.s32.totalorder %s1720_s12, 1  ;;  %p1502_p4 = scmp.ge.s32.totalorder %s1641_s11, 2 }
   0x7   : > { %s1732_s18 = scalar_select %p23_p0, %s1637_s10, %s25_s17  }
   0x8   : > { %p1734_p3 = por %p36_p2, %p35_p1  ;;  %86 = sbr.rel (%p1502_p4) target bundleno = 17 (0x11), region = 16 }
   0x9   : > { %2040 = sst [smem:[#allocation33_spill]] %s1732_s18  ;;  %s88_s20 = sand.u32 (!%p1502_p4), 1, %s1641_s11  }
   0xa   : > { %s1504_s21 = sshll.u32 (!%p1502_p4), %s1641_s11, 1  ;;  %s1503_s22 = sshll.u32 (!%p1502_p4), %s88_s20, 1 }
   0xb   : > { %s92_s25 = scalar_lea.vmem (!%p1502_p4), %s2030_s0, %s1504_s21  ;;  %s90_s26 = scalar_lea.vmem (!%p1502_p4), [#allocation1], %s1503_s22 }
   0xc   : > { %v108_v0 = vld [vmem:[%s92_s25] sm:$0x3] (!%p1502_p4)  ;;  %s129_s29 = scalar_lea.vmem (!%p1502_p4), %s2031_s1, %s1504_s21  ;;  %s166_s16 = scalar_lea.vmem (!%p1502_p4), %s2032_s2, %s1504_s21 }
   0xd   : > { %109 = vst [vmem:[%s90_s26] sm:$0x3] (!%p1502_p4), %v108_v0  ;;  %v145_v1 = vld [vmem:[%s129_s29] sm:$0x3] (!%p1502_p4)  ;;  %s127_s17 = scalar_lea.vmem (!%p1502_p4), [#allocation3], %s1503_s22  ;;  %s203_s23 = scalar_lea.vmem (!%p1502_p4), %s2033_s3, %s1504_s21 }
   0xe   : > { %146 = vst [vmem:[%s127_s17] sm:$0x3] (!%p1502_p4), %v145_v1  ;;  %v182_v2 = vld [vmem:[%s166_s16] sm:$0x3] (!%p1502_p4)  ;;  %s164_s24 = scalar_lea.vmem (!%p1502_p4), [#allocation5], %s1503_s22  ;;  %s201_s25 = scalar_lea.vmem (!%p1502_p4), [#allocation7], %s1503_s22 }
   0xf   : > { %183 = vst [vmem:[%s164_s24] sm:$0x3] %v182_v2  ;;  %v219_v3 = vld [vmem:[%s203_s23] sm:$0x3] }
  0x10   : > { %220 = vst [vmem:[%s201_s25] sm:$0x3] %v219_v3 }
  0x11 PF: > { %p1511_p5 = scmp.ge.s32.totalorder %s1641_s11, 1  ;;  %p236_p6 = scmp.lt.s32.totalorder %s1641_s11, 3 }
  0x13   : > { %p237_p7 = pnand %p1511_p5, %p236_p6 }
  0x15   : > { %240 = sbr.rel (%p237_p7) target bundleno = 999 (0x3e7), region = 140 }
  0x1c   : > { %s259_s26 = sand.u32 1, %s1720_s12   ;;  %s277_s27 = sand.u32 1, %s1633_s30   ;;  %v337_v4 = vlaneseq  ;;  %v1651_v5 = vmov 0.0  }
  0x1d   : > { %s1757_s28 = sshll.u32 %s259_s26, 1  ;;  %s1759_s18 = sshll.u32 %s277_s27, 1  ;;  %332 = vst [vmem:[#allocation12] sm:$0xff] %v1651_v5  ;;  %333 = vst [vmem:[#allocation14] sm:$0xff] %v1651_v5 }
  0x1e   : > { %334 = vst [vmem:[#allocation16] sm:$0xff] %v1651_v5  ;;  %335 = vst [vmem:[#allocation18] sm:$0xff] %v1651_v5  ;;  %v1761_v6 = vand.u32 127, %v337_v4  ;;  %v1763_v7 = vshrl.u32 %v337_v4, 7  ;;  %s261_s11 = scalar_lea.vmem [#allocation1], %s1757_s28  ;;  %s265_s30 = scalar_lea.vmem [#allocation3], %s1757_s28 }
  0x1f   : > { %v304_v8 = vld [vmem:[%s261_s11] sm:$0x3]  ;;  %v308_v9 = vld [vmem:[%s265_s30] sm:$0x3]  ;;  %s269_s21 = scalar_lea.vmem [#allocation5], %s1757_s28  ;;  %s273_s22 = scalar_lea.vmem [#allocation7], %s1757_s28 }
  0x20   : > { %305 = vst [vmem:[#allocation0] sm:$0x3] %v304_v8  ;;  %309 = vst [vmem:[#allocation2] sm:$0x3] %v308_v9  ;;  %v312_v10 = vld [vmem:[%s269_s21] sm:$0x3]  ;;  %v339_v6 = vmov %v1761_v6  ;;  %v342_v7 = vmov %v1763_v7 }
  0x21   : > { %v316_v11 = vld [vmem:[%s273_s22] sm:$0x3]  ;;  %313 = vst [vmem:[#allocation4] sm:$0x3] %v312_v10  ;;  %v352_v6 = vmov %v1761_v6  ;;  %v355_v7 = vmov %v1763_v7  ;;  %s320_s29 = smov [#allocation20]  ;;  %s323_s14 = smov [#allocation21]  ;;  %vm346_vm0 = vcmp.eq.s32.totalorder %v342_v7, %v339_v6 }
  0x22   : > { %317 = vst [vmem:[#allocation6] sm:$0x3] %v316_v11  ;;  %vm359_vm1 = vcmp.eq.s32.totalorder %v355_v7, %v352_v6  ;;  %s336_s15 = smov [#allocation12]  ;;  %s349_s16 = smov [#allocation18]  ;;  %vm1391_vm2 = vcmp.lt.s32.totalorder %v1761_v6, 2  ;;  %v1383_v6 = vmov %v1761_v6  ;;  %v1386_v7 = vmov %v1763_v7 }
  0x23   : > { %s326_s17 = smov [#allocation22]  ;;  %s329_s20 = smov [#allocation23]  ;;  %vm1396_vm3 = vcmp.eq.s32.totalorder %v1386_v7, %v1383_v6  ;;  %v1434_v6 = vmov %v1761_v6  ;;  %v1403_v7 = vmov %v1763_v7 }
  0x24   : > { %v343_v12 = vld [vmem:[%s336_s15] sm:$0x3]  ;;  %s1387_s30 = smov [#allocation20]  ;;  %s1404_s21 = smov [#allocation21]  ;;  %v1400_v6 = vmov %v1761_v6  ;;  %v1437_v7 = vmov %v1763_v7 }
  0x25   : > { %v356_v13 = vld [vmem:[%s349_s16] sm:$0x3]  ;;  %v347_v16 = vsel %vm346_vm0, 1.0, %v343_v12  ;;  %s1421_s22 = smov [#allocation22]  ;;  %v1417_v6 = vmov %v1761_v6  ;;  %v1420_v7 = vmov %v1763_v7  ;;  %vm1447_vm4 = vcmp.eq.s32.totalorder %v1437_v7, %v1434_v6 }
  0x26   : > { %v360_v17 = vsel %vm359_vm1, 1.0, %v356_v13  ;;  %348 = vst [vmem:[%s336_s15] sm:$0x3] %v347_v16 }
  0x27   : > { %v321_v14 = vld [vmem:[#allocation0] sm:$0xff]  ;;  %v324_v15 = vld [vmem:[#allocation2] sm:$0xff]  ;;  %361 = vst [vmem:[%s349_s16] sm:$0x3] %v360_v17 }
  0x28   : > { %322 = vst [vmem:[%s320_s29] sm:$0xff] %v321_v14  ;;  %325 = vst [vmem:[%s323_s14] sm:$0xff] %v324_v15  ;;  %v327_v18 = vld [vmem:[#allocation4] sm:$0xff]  ;;  %s1438_s29 = smov [#allocation23] }
  0x29   : > { %v330_v19 = vld [vmem:[#allocation6] sm:$0xff]  ;;  %328 = vst [vmem:[%s326_s17] sm:$0xff] %v327_v18 }
  0x2a   : > { %331 = vst [vmem:[%s329_s20] sm:$0xff] %v330_v19 }
  0x2f   : > { %v1393_v20 = vld [vmem:[%s1387_s30] sm:$0x3] }
  0x30   : > { %v1410_v21 = vld [vmem:[%s1404_s21] sm:$0x3]  ;;  %v1394_v22 = vsel %vm1391_vm2, %v1393_v20, 0.0 }
  0x31   : > { %v1411_v23 = vsel %vm1391_vm2, %v1410_v21, 0.0  ;;  %v1427_v24 = vld [vmem:[%s1421_s22] sm:$0x3]  ;;  %v1395_v26 = vmul.f32 %v1394_v22, %v1394_v22 }
  0x32   : > { %v1444_v25 = vld [vmem:[%s1438_s29] sm:$0x3]  ;;  %v1412_v27 = vmul.f32 %v1411_v23, %v1411_v23  ;;  %v1428_v28 = vsel %vm1391_vm2, %v1427_v24, 0.0 }
  0x33   : > { %v1445_v29 = vsel %vm1391_vm2, %v1444_v25, 0.0  ;;  %v1429_v30 = vmul.f32 %v1428_v28, %v1428_v28  ;;  %v1397_v33 = vsel %vm1396_vm3, 0.0, %v1395_v26 }
  0x34   : > { %v1414_v31 = vadd.f32 %v1412_v27, %v1395_v26  ;;  %v1446_v32 = vmul.f32 %v1445_v29, %v1445_v29  ;;  %v1413_v34 = vadd.f32 %v1412_v27, %v1397_v33 }
  0x36   : > { %v1431_v35 = vadd.f32 %v1429_v30, %v1414_v31  ;;  %v1430_v36 = vadd.f32 %v1429_v30, %v1413_v34  ;;  %v1448_v37 = vsel %vm1447_vm4, 0.0, %v1446_v32 }
  0x38   : > { %v1450_v38 = vadd.f32 %v1446_v32, %v1431_v35  ;;  %v1449_v39 = vadd.f32 %v1448_v37, %v1430_v36 }
  0x3a   : > { %1451 = vadd.xlane.f32.xlu0 %v1450_v38 }
  0x3e   : > { %1459 = vadd.xlane.f32.xlu0 %v1449_v39 }
  0xc7   : > { %v1452_v40 = vpop.xlane.xlu0 %1451 }
  0xc8   : > { %v1453_v41 = vrot.slane %v1452_v40, 4 }
  0xca   : > { %v1454_v42 = vadd.f32 %v1453_v41, %v1452_v40 }
  0xcb   : > { %v1460_v43 = vpop.xlane.xlu0 %1459 }
  0xcc   : > { %v1455_v44 = vrot.slane %v1454_v42, 2  ;;  %v1461_v45 = vrot.slane %v1460_v43, 4 }
  0xce   : > { %v1462_v46 = vadd.f32 %v1461_v45, %v1460_v43  ;;  %v1456_v47 = vadd.f32 %v1455_v44, %v1454_v42 }
  0xd0   : > { %v1463_v48 = vrot.slane %v1462_v46, 2  ;;  %v1457_v50 = vrot.slane %v1456_v47, 1 }
  0xd2   : > { %v1464_v49 = vadd.f32 %v1463_v48, %v1462_v46  ;;  %v1458_v53 = vadd.f32 %v1457_v50, %v1456_v47 }
  0xd4   : > { %v1465_v51 = vrot.slane %v1464_v49, 1 }
  0xd6   : > { %v1466_v52 = vadd.f32 %v1465_v51, %v1464_v49 }
  0xd8   : > { %1552 = vpush %v1466_v52 }
  0xd9   : > { %1554 = vpush %v1458_v53 }
 0x109   : > { %s1553_s14 = spop %1552 }
 0x10a   : > { %s1555_s15 = spop %1554 }
 0x10b   : > { %s1469_s16 = smul.f32 1e-10, %s1555_s15 }
 0x10d   : > { %p1470_p8 = scmp.le.f32.partialorder %s1553_s14, %s1469_s16 }
 0x10e   : > { %s1797_s17 = smov (!%p1470_p8), 0  }
 0x10f   : > { %1473 = sbr.rel (%p1470_p8) target bundleno = 953 (0x3b9), region = 467 }
 0x116 LB: >> { %s1802_s20 = smov 0   ;;  %s1645_s17 = sphi %s1797_s17, %s2042_s17  }
 0x117 LB: >>> { %s466_s30 = smov [#allocation20]  ;;  %v470_v6 = vmov %v1761_v6  ;;  %v473_v7 = vmov %v1763_v7  ;;  %s486_s21 = smov [#allocation21]  ;;  %vm789_vm14 = vcmp.eq.s32.totalorder %v1763_v7, 0  ;;  %vm801_vm15 = vcmp.eq.s32.totalorder %v1763_v7, 1  ;;  %s1649_s20 = sphi %s1802_s20, %s465_s20  }
 0x118   : >>> { %v490_v6 = vmov %v1761_v6  ;;  %v493_v7 = vmov %v1763_v7  ;;  %v474_v54 = vld [vmem:[%s466_s30] sm:$0x3]  ;;  %vm477_vm5 = vcmp.eq.s32.totalorder %v473_v7, %v470_v6  ;;  %s506_s22 = smov [#allocation23]  ;;  %s467_s29 = smov [#allocation24] }
 0x119   : >>> { %vm497_vm6 = vcmp.eq.s32.totalorder %v493_v7, %v490_v6  ;;  %v510_v6 = vmov %v1761_v6  ;;  %v513_v7 = vmov %v1763_v7  ;;  %v478_v55 = vsel %vm477_vm5, %v474_v54, 0.0  ;;  %v494_v56 = vld [vmem:[%s486_s21] sm:$0x3]  ;;  %s487_s14 = smov [#allocation25]  ;;  %s507_s15 = smov [#allocation26] }
 0x11a   : >>> { %vm517_vm7 = vcmp.eq.s32.totalorder %v513_v7, %v510_v6  ;;  %v479_v57 = vrot.slane %v478_v55, 4  ;;  %v498_v58 = vsel %vm497_vm6, %v494_v56, 0.0  ;;  %v514_v59 = vld [vmem:[%s506_s22] sm:$0x3]  ;;  %s530_s16 = smov [#allocation25]  ;;  %s528_s30 = smov [#allocation24]  ;;  %v579_v6 = vmov %v1761_v6 }
 0x11b   : >>> { %v499_v60 = vrot.slane %v498_v58, 4  ;;  %v518_v61 = vsel %vm517_vm7, %v514_v59, 0.0  ;;  %s532_s21 = smov [#allocation26]  ;;  %s567_s22 = smov [#allocation27]  ;;  %v582_v7 = vmov %v1763_v7  ;;  %v594_v6 = vmov %v1761_v6 }
 0x11c   : >>> { %v480_v62 = vadd.f32 %v479_v57, %v478_v55  ;;  %v519_v63 = vrot.slane %v518_v61, 4  ;;  %v597_v7 = vmov %v1763_v7  ;;  %vm584_vm12 = vcmp.eq.s32.totalorder %v582_v7, %v579_v6  ;;  %s1821_s24 = smov [#allocation22]  ;;  %s1827_s23 = smov [#allocation14] }
 0x11d   : >>> { %v500_v0 = vadd.f32 %v499_v60, %v498_v58  ;;  %vm599_vm13 = vcmp.eq.s32.totalorder %v597_v7, %v594_v6  ;;  %s829_s11 = smov [#allocation31]  ;;  %s1833_s27 = smov [#allocation18]  ;;  %v615_v55 = vld [vmem:[%s1821_s24] sm:$0x3]  ;;  %v692_v6 = vmov %v1761_v6  ;;  %v695_v7 = vmov %v1763_v7 }
 0x11e   : >>> { %v481_v1 = vrot.slane %v480_v62, 2  ;;  %v520_v2 = vadd.f32 %v519_v63, %v518_v61  ;;  %v838_v58 = vld [vmem:[%s1827_s23] sm:$0x3]  ;;  %s607_s26 = smov [#allocation32]  ;;  %s831_s25 = smov [#allocation32]  ;;  %v706_v6 = vmov %v1761_v6  ;;  %v709_v7 = vmov %v1763_v7 }
 0x11f   : >>> { %v501_v3 = vrot.slane %v500_v0, 2  ;;  %v840_v61 = vld [vmem:[%s1833_s27] sm:$0x3]  ;;  %vm699_vm0 = vcmp.eq.s32.totalorder %v695_v7, %v692_v6  ;;  %v665_v6 = vmov %v1761_v6  ;;  %v668_v7 = vmov %v1763_v7  ;;  %s465_s20 = sadd.s32 1, %s1649_s20  }
 0x120   : >>> { %v482_v4 = vadd.f32 %v481_v1, %v480_v62  ;;  %v521_v5 = vrot.slane %v520_v2, 2  ;;  %v679_v6 = vmov %v1761_v6  ;;  %v682_v7 = vmov %v1763_v7  ;;  %p462_p9 = scmp.ge.s32.totalorder %s465_s20, 3  }
 0x121   : >>> { %v502_v8 = vadd.f32 %v501_v3, %v500_v0  ;;  %vm714_vm1 = vcmp.eq.s32.totalorder %v709_v7, %v706_v6  ;;  %vm673_vm3 = vcmp.eq.s32.totalorder %v668_v7, %v665_v6  ;;  %vm686_vm4 = vcmp.eq.s32.totalorder %v682_v7, %v679_v6 }
 0x122   : >>> { %v483_v9 = vrot.slane %v482_v4, 1  ;;  %v522_v10 = vadd.f32 %v521_v5, %v520_v2  ;;  %vm728_vm5 = vcmp.eq.s32.totalorder %v1761_v6, 0  ;;  %vm732_vm6 = vcmp.eq.s32.totalorder %v1761_v6, 1 }
 0x123   : >>> { %v503_v11 = vrot.slane %v502_v8, 1  ;;  %v366_v6 = vmov (%p462_p9), %v1761_v6  ;;  %v369_v7 = vmov (%p462_p9), %v1763_v7 }
 0x124   : >>> { %v484_v12 = vadd.f32 %v483_v9, %v482_v4  ;;  %v523_v13 = vrot.slane %v522_v10, 1  ;;  %v419_v6 = vmov (%p462_p9), %v1761_v6  ;;  %vm381_vm7 = vcmp.eq.s32.totalorder (%p462_p9), %v369_v7, %v366_v6 }
 0x125   : >>> { %v504_v14 = vadd.f32 %v503_v11, %v502_v8  ;;  %v422_v7 = vmov (%p462_p9), %v1763_v7  ;;  %v385_v6 = vmov (%p462_p9), %v1761_v6 }
 0x126   : >>> { %485 = vst [vmem:[%s467_s29] sm:$0x1] %v484_v12  ;;  %v524_v15 = vadd.f32 %v523_v13, %v522_v10  ;;  %s569_s29 = smov [#allocation28]  ;;  %v388_v7 = vmov (%p462_p9), %v1763_v7  ;;  %v402_v6 = vmov (%p462_p9), %v1761_v6 }
 0x127   : >>> { %505 = vst [vmem:[%s487_s14] sm:$0x1] %v504_v14  ;;  %s526_s14 = smov [#allocation29]  ;;  %v405_v7 = vmov (%p462_p9), %v1763_v7 }
 0x128   : >>> { %525 = vst [vmem:[%s507_s15] sm:$0x1] %v524_v15  ;;  %s527_s15 = smov [#allocation30]  ;;  %s571_s14 = smov %s526_s14 }
 0x129   : >>> { %s573_s15 = smov %s527_s15 }
 0x12d   : >>> { %v529_v18 = vld [vmem:[%s528_s30] sm:$0xff]  ;;  %s590_s30 = smov [#allocation30] }
 0x12e   : >>> { %v531_v16 = vld [vmem:[%s530_s16] sm:$0xff]  ;;  %v552_v31 = vand.u32 2147483647, %v529_v18  ;;  %s575_s16 = smov [#allocation29] }
 0x12f   : >>> { %v535_v17 = vmul.f32 2.0, %v531_v16  ;;  %v533_v19 = vld [vmem:[%s532_s21] sm:$0xff]  ;;  %v553_v36 = vand.u32 2147483647, %v531_v16  ;;  %s588_s21 = smov [#allocation31] }
 0x130   : >>> { %v534_v20 = vsub.f32 %v533_v19, %v529_v18  ;;  %v554_v32 = vand.u32 2147483647, %v533_v19 }
 0x131   : >>> { %1603 = vrcp.f32 %v535_v17 }
 0x132   : >>> { %v555_v35 = vmin.f32 %v552_v31, %v554_v32 }
 0x134   : >>> { %v556_v37 = vmul.f32 1.1920929e-08, %v555_v35 }
 0x136   : >>> { %vm557_vm11 = vcmp.le.f32.partialorder %v553_v36, %v556_v37 }
 0x13b   : >>> { %v1604_v21 = vpop.eup %1603 }
 0x13c   : >>> { %v537_v22 = vmul.f32 %v1604_v21, %v534_v20 }
 0x13e   : >>> { %v539_v23 = vmul.f32 %v537_v22, %v537_v22  ;;  %vm538_vm10 = vcmp.ge.f32.partialorder %v537_v22, 0.0 }
 0x140   : >>> { %v540_v24 = vadd.f32 1.0, %v539_v23 }
 0x142   : >>> { %1605 = vrsqrt.f32 %v540_v24  ;;  %vm543_vm8 = vcmp.eq.f32.partialorder %v540_v24, inf  ;;  %v546_v26 = vand.u32 2147483648, %v540_v24  ;;  %vm545_vm9 = vcmp.eq.f32.partialorder %v540_v24, 0.0 }
 0x14c   : >>> { %v1606_v25 = vpop.eup %1605 }
 0x14d   : >>> { %v542_v27 = vmul.f32 %v1606_v25, %v540_v24 }
 0x14f   : >>> { %v544_v28 = vsel %vm543_vm8, %v540_v24, %v542_v27  ;;  %vm434_vm8 = vcmp.eq.s32.totalorder (%p462_p9), %v422_v7, %v419_v6 }
 0x150   : >>> { %v547_v29 = vsel %vm545_vm9, %v546_v26, %v544_v28 }
 0x151   : >>> { %v548_v30 = vxor.u32 2147483648, %v547_v29 }
 0x153   : >>> { %v549_v33 = vsel %vm538_vm10, %v547_v29, %v548_v30 }
 0x154   : >>> { %v550_v34 = vadd.f32 %v549_v33, %v537_v22 }
 0x156   : >>> { %1607 = vrcp.f32 %v550_v34 }
 0x160   : >>> { %v1608_v38 = vpop.eup %1607 }
 0x161   : >>> { %v558_v39 = vsel %vm557_vm11, 0.0, %v1608_v38 }
 0x162   : >>> { %v559_v40 = vmul.f32 %v558_v39, %v558_v39  ;;  %v563_v41 = vmul.f32 %v558_v39, %v531_v16 }
 0x164   : >>> { %v560_v42 = vadd.f32 1.0, %v559_v40  ;;  %v564_v43 = vsub.f32 %v529_v18, %v563_v41  ;;  %v566_v44 = vadd.f32 %v563_v41, %v533_v19 }
 0x166   : >>> { %1609 = vrsqrt.f32 %v560_v42  ;;  %568 = vst [vmem:[%s567_s22] sm:$0xff] %v564_v43  ;;  %570 = vst [vmem:[%s569_s29] sm:$0xff] %v566_v44  ;;  %s605_s22 = smov [#allocation31]  ;;  %s1817_s29 = smov [#allocation20] }
 0x167   : >>> { %v613_v53 = vld [vmem:[%s1817_s29] sm:$0x3] }
 0x170   : >>> { %v1610_v45 = vpop.eup %1609 }
 0x171   : >>> { %572 = vst [vmem:[%s571_s14] sm:$0xff] %v1610_v45  ;;  %v562_v46 = vmul.f32 %v1610_v45, %v558_v39  ;;  %s603_s14 = smov [#allocation32] }
 0x173   : >>> { %574 = vst [vmem:[%s573_s15] sm:$0xff] %v562_v46  ;;  %s1819_s15 = smov [#allocation21] }
 0x174   : >>> { %v614_v54 = vld [vmem:[%s1819_s15] sm:$0x3] }
 0x178   : >>> { %v576_v47 = vld [vmem:[%s575_s16] ss:$0 sm:$0xff]  ;;  %s1823_s16 = smov [#allocation23] }
 0x179   : >>> { %v585_v48 = vsel %vm584_vm12, %v576_v47, 0.0  ;;  %v616_v56 = vld [vmem:[%s1823_s16] sm:$0x3] }
 0x17a   : >>> { %586 = vadd.xlane.f32.xlu0 %v585_v48  ;;  %v591_v49 = vld [vmem:[%s590_s30] ss:$0 sm:$0xff]  ;;  %s1825_s30 = smov [#allocation12] }
 0x17b   : >>> { %v600_v50 = vsel %vm599_vm13, %v591_v49, 0.0  ;;  %v837_v57 = vld [vmem:[%s1825_s30] sm:$0x3] }
 0x17e   : >>> { %601 = vadd.xlane.f32.xlu0 %v600_v50 }
 0x207   : >>> { %v587_v51 = vpop.xlane.xlu0 %586 }
 0x208   : >>> { %589 = vst [vmem:[%s588_s21] sm:$0xff] %v587_v51  ;;  %s1829_s21 = smov [#allocation16] }
 0x209   : >>> { %v839_v59 = vld [vmem:[%s1829_s21] sm:$0x3] }
 0x20b   : >>> { %v602_v52 = vpop.xlane.xlu0 %601 }
 0x20c   : >>> { %604 = vst [vmem:[%s603_s14] sm:$0xff] %v602_v52  ;;  %s1853_s14 = smov [#allocation23] }
 0x20f   : >>> { %v606_v60 = vld [vmem:[%s605_s22] sm:$0xff]  ;;  %s1851_s22 = smov [#allocation22] }
 0x210   : >>> { %v830_v62 = vld [vmem:[%s829_s11] sm:$0xff]  ;;  %v617_v63 = vmul.f32 %v613_v53, %v606_v60  ;;  %v620_v0 = vmul.f32 %v614_v54, %v606_v60  ;;  %v624_v1 = vmul.f32 %v615_v55, %v606_v60  ;;  %v627_v2 = vmul.f32 %v616_v56, %v606_v60  ;;  %s1849_s11 = smov [#allocation12] }
 0x211   : >>> { %v841_v3 = vmul.f32 %v837_v57, %v830_v62  ;;  %v844_v4 = vmul.f32 %v838_v58, %v830_v62  ;;  %v848_v5 = vmul.f32 %v839_v59, %v830_v62  ;;  %v851_v8 = vmul.f32 %v840_v61, %v830_v62 }
 0x213   : >>> { %v608_v9 = vld [vmem:[%s607_s26] sm:$0xff]  ;;  %s635_s26 = smov [#allocation30] }
 0x214   : >>> { %v832_v10 = vld [vmem:[%s831_s25] sm:$0xff]  ;;  %v618_v11 = vmul.f32 %v615_v55, %v608_v9  ;;  %v621_v12 = vmul.f32 %v616_v56, %v608_v9  ;;  %v623_v13 = vmul.f32 %v613_v53, %v608_v9  ;;  %v626_v14 = vmul.f32 %v614_v54, %v608_v9  ;;  %s633_s25 = smov [#allocation29] }
 0x215   : >>> { %v842_v15 = vmul.f32 %v839_v59, %v832_v10  ;;  %v845_v16 = vmul.f32 %v840_v61, %v832_v10  ;;  %v847_v17 = vmul.f32 %v837_v57, %v832_v10  ;;  %v850_v18 = vmul.f32 %v838_v58, %v832_v10  ;;  %v634_v27 = vld [vmem:[%s633_s25] ss:$0 sm:$0xff]  ;;  %s662_s25 = smov [#allocation27] }
 0x216   : >>> { %v619_v19 = vsub.f32 %v617_v63, %v618_v11  ;;  %v622_v20 = vsub.f32 %v620_v0, %v621_v12  ;;  %v625_v21 = vadd.f32 %v624_v1, %v623_v13  ;;  %v628_v22 = vadd.f32 %v627_v2, %v626_v14  ;;  %v636_v28 = vld [vmem:[%s635_s26] ss:$0 sm:$0xff]  ;;  %s661_s26 = smov [#allocation20] }
 0x217   : >>> { %v843_v23 = vsub.f32 %v841_v3, %v842_v15  ;;  %v846_v24 = vsub.f32 %v844_v4, %v845_v16  ;;  %v849_v25 = vadd.f32 %v848_v5, %v847_v17  ;;  %v852_v26 = vadd.f32 %v851_v8, %v850_v18  ;;  %v669_v63 = vld [vmem:[%s662_s25] ss:$0 sm:$0xff]  ;;  %s905_s25 = sadd.s32 (%p462_p9), 1, %s1645_s17  }
 0x218   : >>> { %630 = vst [vmem:[%s1819_s15] sm:$0x3] %v622_v20  ;;  %632 = vst [vmem:[%s1823_s16] sm:$0x3] %v628_v22  ;;  %s1855_s15 = smov [#allocation20]  ;;  %s703_s16 = smov [#allocation28] }
 0x219   : >>> { %629 = vst [vmem:[%s1817_s29] sm:$0x3] %v619_v19  ;;  %631 = vst [vmem:[%s1821_s24] sm:$0x3] %v625_v21  ;;  %s1857_s24 = smov [#allocation16]  ;;  %s1865_s29 = smov [#allocation21]  ;;  %v710_v59 = vld [vmem:[%s703_s16] ss:$0 sm:$0xff] }
 0x21a   : >>> { %853 = vst [vmem:[%s1825_s30] sm:$0x3] %v843_v23  ;;  %854 = vst [vmem:[%s1827_s23] sm:$0x3] %v846_v24  ;;  %s1859_s23 = smov [#allocation14]  ;;  %s689_s30 = smov [#allocation22] }
 0x21b   : >>> { %855 = vst [vmem:[%s1829_s21] sm:$0x3] %v849_v25  ;;  %856 = vst [vmem:[%s1833_s27] sm:$0x3] %v852_v26  ;;  %s1863_s27 = smov [#allocation18]  ;;  %s702_s21 = smov [#allocation23] }
 0x21c   : >>> { %s805_s16 = smov [#allocation21]  ;;  %p458_p10 = scmp.ge.s32.totalorder (%p462_p9), %s905_s25, 15 }
 0x21d   : >> { %s2042_s17 = smov (%p462_p9), %s905_s25 }
 0x21f   : >>> { %v644_v30 = vld [vmem:[%s1853_s14] sm:$0x3] }
 0x220   : >>> { %v643_v29 = vld [vmem:[%s1851_s22] sm:$0x3]  ;;  %v652_v36 = vmul.f32 %v644_v30, %v636_v28  ;;  %v655_v42 = vmul.f32 %v644_v30, %v634_v27 }
 0x221   : >>> { %v641_v31 = vld [vmem:[%s1855_s15] sm:$0x3]  ;;  %v651_v35 = vmul.f32 %v643_v29, %v634_v27  ;;  %v654_v37 = vmul.f32 %v643_v29, %v636_v28 }
 0x222   : >>> { %v859_v32 = vld [vmem:[%s1849_s11] ss:$0 sm:$0xff]  ;;  %v1531_v34 = vld [vmem:[%s1849_s11 + $0x1] ss:$0 sm:$0xff]  ;;  %v645_v48 = vmul.f32 %v641_v31, %v634_v27  ;;  %v648_v49 = vmul.f32 %v641_v31, %v636_v28 }
 0x223   : >>> { %v1530_v33 = vld [vmem:[%s1849_s11 - $0x1] sm:$0x2]  ;;  %v1533_v40 = vld [vmem:[%s1857_s24 + $0x1] sm:$0x1]  ;;  %v653_v47 = vsub.f32 %v651_v35, %v652_v36  ;;  %v656_v53 = vadd.f32 %v655_v42, %v654_v37 }
 0x224   : >>> { %v866_v38 = vsel %vm789_vm14, %v859_v32, %v1530_v33  ;;  %v870_v39 = vld [vmem:[%s1857_s24] ss:$0 sm:$0xff]  ;;  %v878_v43 = vsel %vm801_vm15, %v1531_v34, %v1533_v40  ;;  %v1535_v45 = vld [vmem:[%s1859_s23 + $0x1] ss:$0 sm:$0xff] }
 0x225   : >>> { %v883_v41 = vld [vmem:[%s1859_s23] ss:$0 sm:$0xff]  ;;  %869 = vst [vmem:[%s1849_s11] sm:$0x3] %v866_v38  ;;  %880 = vst [vmem:[%s1857_s24] sm:$0x3] %v878_v43  ;;  %v1537_v51 = vld [vmem:[%s1863_s27 + $0x1] sm:$0x1] }
 0x226   : >>> { %v1534_v44 = vld [vmem:[%s1859_s23 - $0x1] sm:$0x2]  ;;  %1532 = vst [vmem:[%s1849_s11 + $0x1] sm:$0x1] %v870_v39  ;;  %v902_v54 = vsel %vm801_vm15, %v1535_v45, %v1537_v51  ;;  %659 = vst [vmem:[%s1851_s22] sm:$0x3] %v653_v47  ;;  %s676_s11 = smov [#allocation21] }
 0x227   : >>> { %v894_v46 = vld [vmem:[%s1863_s27] ss:$0 sm:$0xff]  ;;  %v890_v50 = vsel %vm789_vm14, %v883_v41, %v1534_v44  ;;  %660 = vst [vmem:[%s1853_s14] sm:$0x3] %v656_v53  ;;  %s1907_s22 = smov [#allocation22]  ;;  %s1652_s14 = smov 1  }
 0x228   : >>> { %v642_v52 = vld [vmem:[%s1865_s29] sm:$0x3]  ;;  %893 = vst [vmem:[%s1859_s23] sm:$0x3] %v890_v50  ;;  %904 = vst [vmem:[%s1863_s27] sm:$0x3] %v902_v54  ;;  %s718_s24 = smov [#allocation21]  ;;  %s1910_s27 = smov [#allocation23] }
 0x229   : >>> { %v646_v55 = vmul.f32 %v642_v52, %v636_v28  ;;  %v649_v56 = vmul.f32 %v642_v52, %v634_v27  ;;  %1536 = vst [vmem:[%s1859_s23 + $0x1] sm:$0x1] %v894_v46  ;;  %s1653_s23 = smov 127  }
 0x22b   : >>> { %v647_v57 = vsub.f32 %v645_v48, %v646_v55  ;;  %v650_v58 = vadd.f32 %v649_v56, %v648_v49 }
 0x22d   : >>> { %657 = vst [vmem:[%s1855_s15] sm:$0x3] %v647_v57  ;;  %658 = vst [vmem:[%s1865_s29] sm:$0x3] %v650_v58  ;;  %v696_v60 = vld [vmem:[%s689_s30] sm:$0x3]  ;;  %s717_s15 = smov [#allocation20]  ;;  %s781_s29 = smov [#allocation20] }
 0x22e   : >>> { %v700_v61 = vsel %vm699_vm0, 0.0, %v696_v60  ;;  %v711_v62 = vld [vmem:[%s702_s21] sm:$0x3] }
 0x22f   : >>> { %701 = vst [vmem:[%s689_s30] sm:$0x3] %v700_v61  ;;  %v715_v0 = vsel %vm714_vm1, %v710_v59, %v711_v62  ;;  %s782_s30 = smov [#allocation22] }
 0x230   : >>> { %716 = vst [vmem:[%s702_s21] sm:$0x3] %v715_v0  ;;  %s806_s21 = smov [#allocation23] }
 0x234   : >>> { %v670_v1 = vld [vmem:[%s661_s26] sm:$0x3] }
 0x235   : >>> { %v683_v2 = vld [vmem:[%s676_s11] sm:$0x3]  ;;  %v674_v3 = vsel %vm673_vm3, %v669_v63, %v670_v1 }
 0x236   : >>> { %v687_v4 = vsel %vm686_vm4, 0.0, %v683_v2  ;;  %675 = vst [vmem:[%s661_s26] sm:$0x3] %v674_v3  ;;  %v755_v5 = vld [vmem:[%s1907_s22] sm:$0x3]  ;;  %s370_s26 = smov (%p462_p9), [#allocation20] }
 0x237   : >>> { %688 = vst [vmem:[%s676_s11] sm:$0x3] %v687_v4  ;;  %756 = vrot.lane.b32.xlu0 %v755_v5, %s1652_s14  ;;  %v751_v11 = vld [vmem:[%s1910_s27] sm:$0x3]  ;;  %s389_s11 = smov (%p462_p9), [#allocation21] }
 0x238   : >>> { %v772_v12 = vld [vmem:[%s1910_s27] sm:$0x3] }
 0x239   : >>> { %v754_v30 = vld [vmem:[%s1907_s22] sm:$0x3] }
 0x23d   : >>> { %v723_v8 = vld [vmem:[%s717_s15] sm:$0x3] }
 0x23e   : >>> { %724 = vrot.lane.b32.xlu1 %v723_v8, %s1652_s14  ;;  %v719_v9 = vld [vmem:[%s718_s24] sm:$0x3] }
 0x23f   : >>> { %v740_v10 = vld [vmem:[%s718_s24] sm:$0x3] }
 0x240   : >>> { %v722_v18 = vld [vmem:[%s717_s15] sm:$0x3] }
 0x242   : >>> { %720 = vrot.lane.b32.xlu1 %v719_v9, %s1652_s14 }
 0x246   : >>> { %741 = vrot.lane.b32.xlu1 %v740_v10, %s1653_s23 }
 0x24a   : >>> { %752 = vrot.lane.b32.xlu1 %v751_v11, %s1652_s14  ;;  %s423_s14 = smov (%p462_p9), [#allocation23] }
 0x24e   : >>> { %773 = vrot.lane.b32.xlu1 %v772_v12, %s1653_s23 }
 0x2a9   : >>> { %v757_v20 = vpop.permute.xlu0 %756 }
 0x2aa   : >>> { %v761_v22 = vsel %vm728_vm5, %v755_v5, %v757_v20 }
 0x2b0   : >>> { %v725_v13 = vpop.permute.xlu1 %724 }
 0x2b1   : >>> { %v729_v14 = vsel %vm728_vm5, %v723_v8, %v725_v13 }
 0x2b4   : >>> { %v721_v15 = vpop.permute.xlu1 %720 }
 0x2b5   : >>> { %v733_v16 = vsel %vm732_vm6, %v721_v15, %v729_v14 }
 0x2b6   : >>> { %v739_v17 = vsel %vm1391_vm2, %v733_v16, 0.0 }
 0x2b7   : >>> { %747 = vst [vmem:[%s717_s15] sm:$0x3] %v739_v17 }
 0x2b8   : >>> { %v742_v19 = vpop.permute.xlu1 %741 }
 0x2b9   : >>> { %v746_v21 = vsel %vm732_vm6, %v722_v18, %v742_v19 }
 0x2ba   : >>> { %748 = vst [vmem:[%s718_s24] sm:$0x3] %v746_v21 }
 0x2bc   : >>> { %v753_v23 = vpop.permute.xlu1 %752 }
 0x2bd   : >>> { %v765_v24 = vsel %vm732_vm6, %v753_v23, %v761_v22 }
 0x2be   : >>> { %v783_v25 = vld [vmem:[%s781_s29] ss:$0 sm:$0xff]  ;;  %v1523_v27 = vld [vmem:[%s781_s29 + $0x1] ss:$0 sm:$0xff]  ;;  %v771_v29 = vsel %vm1391_vm2, %v765_v24, 0.0 }
 0x2bf   : >>> { %v1522_v26 = vld [vmem:[%s781_s29 - $0x1] sm:$0x2]  ;;  %779 = vst [vmem:[%s1907_s22] sm:$0x3] %v771_v29  ;;  %s406_s22 = smov (%p462_p9), [#allocation22] }
 0x2c0   : >>> { %v790_v28 = vsel %vm789_vm14, %v783_v25, %v1522_v26  ;;  %v774_v31 = vpop.permute.xlu1 %773 }
 0x2c1   : >>> { %793 = vst [vmem:[%s781_s29] sm:$0x3] %v790_v28  ;;  %v807_v32 = vld [vmem:[%s805_s16] ss:$0 sm:$0xff]  ;;  %v1527_v34 = vld [vmem:[%s805_s16 + $0x1] ss:$0 sm:$0xff]  ;;  %v778_v35 = vsel %vm732_vm6, %v754_v30, %v774_v31 }
 0x2c2   : >>> { %v1526_v33 = vld [vmem:[%s805_s16 - $0x1] sm:$0x2]  ;;  %780 = vst [vmem:[%s1910_s27] sm:$0x3] %v778_v35 }
 0x2c3   : >>> { %v814_v36 = vsel %vm789_vm14, %v807_v32, %v1526_v33 }
 0x2c4   : >>> { %817 = vst [vmem:[%s805_s16] sm:$0x3] %v814_v36 }
 0x2c6   : >>> { %v794_v37 = vld [vmem:[%s782_s30] ss:$0 sm:$0xff]  ;;  %v1525_v38 = vld [vmem:[%s782_s30 + $0x1] sm:$0x1] }
 0x2c7   : >>> { %1524 = vst [vmem:[%s781_s29 + $0x1] sm:$0x1] %v794_v37  ;;  %v802_v39 = vsel %vm801_vm15, %v1523_v27, %v1525_v38  ;;  %464 = sbr.rel (!%p462_p9) target bundleno = 279 (0x117), region = 462 }
 0x2c8   : >>> { %804 = vst [vmem:[%s782_s30] sm:$0x3] %v802_v39 }
 0x2c9   : >>> { %v818_v40 = vld [vmem:[%s806_s21] ss:$0 sm:$0xff]  ;;  %v1529_v41 = vld [vmem:[%s806_s21 + $0x1] sm:$0x1] }
 0x2ca   : >>> { %1528 = vst [vmem:[%s805_s16 + $0x1] sm:$0x1] %v818_v40  ;;  %v826_v42 = vsel %vm801_vm15, %v1527_v34, %v1529_v41 }
 0x2cb   : >>> { %828 = vst [vmem:[%s806_s21] sm:$0x3] %v826_v42 }
 0x2ce   : >> { %v376_v43 = vld [vmem:[%s370_s26] sm:$0x3] }
 0x2cf   : >> { %v377_v45 = vsel %vm1391_vm2, %v376_v43, 0.0  ;;  %v412_v47 = vld [vmem:[%s406_s22] sm:$0x3] }
 0x2d0   : >> { %v378_v49 = vmul.f32 %v377_v45, %v377_v45  ;;  %v413_v51 = vsel %vm1391_vm2, %v412_v47, 0.0 }
 0x2d1   : >> { %v395_v44 = vld [vmem:[%s389_s11] sm:$0x3]  ;;  %v414_v53 = vmul.f32 %v413_v51, %v413_v51 }
 0x2d2   : >> { %v396_v46 = vsel %vm1391_vm2, %v395_v44, 0.0  ;;  %v429_v48 = vld [vmem:[%s423_s14] sm:$0x3]  ;;  %v382_v56 = vsel %vm381_vm7, 0.0, %v378_v49 }
 0x2d3   : >> { %v397_v50 = vmul.f32 %v396_v46, %v396_v46  ;;  %v430_v52 = vsel %vm1391_vm2, %v429_v48, 0.0 }
 0x2d4   : >> { %v431_v55 = vmul.f32 %v430_v52, %v430_v52 }
 0x2d5   : >> { %v399_v54 = vadd.f32 %v397_v50, %v378_v49  ;;  %v398_v57 = vadd.f32 %v397_v50, %v382_v56 }
 0x2d6   : >> { %v435_v60 = vsel %vm434_vm8, 0.0, %v431_v55 }
 0x2d7   : >> { %v416_v58 = vadd.f32 %v414_v53, %v399_v54  ;;  %v415_v59 = vadd.f32 %v414_v53, %v398_v57 }
 0x2d9   : >> { %v437_v61 = vadd.f32 %v431_v55, %v416_v58  ;;  %v436_v62 = vadd.f32 %v435_v60, %v415_v59 }
 0x2db   : >> { %438 = vadd.xlane.f32.xlu0 %v437_v61 }
 0x2df   : >> { %446 = vadd.xlane.f32.xlu0 %v436_v62 }
 0x368   : >> { %v439_v63 = vpop.xlane.xlu0 %438 }
 0x369   : >> { %v440_v0 = vrot.slane %v439_v63, 4 }
 0x36b   : >> { %v441_v1 = vadd.f32 %v440_v0, %v439_v63 }
 0x36c   : >> { %v447_v2 = vpop.xlane.xlu0 %446 }
 0x36d   : >> { %v442_v3 = vrot.slane %v441_v1, 2  ;;  %v448_v4 = vrot.slane %v447_v2, 4 }
 0x36f   : >> { %v449_v5 = vadd.f32 %v448_v4, %v447_v2  ;;  %v443_v8 = vadd.f32 %v442_v3, %v441_v1 }
 0x371   : >> { %v450_v9 = vrot.slane %v449_v5, 2  ;;  %v444_v11 = vrot.slane %v443_v8, 1 }
 0x373   : >> { %v451_v10 = vadd.f32 %v450_v9, %v449_v5  ;;  %v445_v14 = vadd.f32 %v444_v11, %v443_v8 }
 0x375   : >> { %v452_v12 = vrot.slane %v451_v10, 1 }
 0x377   : >> { %v453_v13 = vadd.f32 %v452_v12, %v451_v10 }
 0x379   : >> { %1556 = vpush %v453_v13 }
 0x37a   : >> { %1558 = vpush %v445_v14 }
 0x3aa   : >> { %s1557_s20 = spop %1556 }
 0x3ab   : >> { %s1559_s15 = spop %1558 }
 0x3ac   : >> { %s456_s24 = smul.f32 1e-10, %s1559_s15 }
 0x3ae   : >> { %p457_p11 = scmp.le.f32.partialorder %s1557_s20, %s456_s24 }
 0x3b0   : >> { %p459_p12 = por %p458_p10, %p457_p11 }
 0x3b2   : > { %907 = sbr.rel (!%p459_p12) target bundleno = 278 (0x116), region = 473 }
 0x3b9 PF: > { %s912_s23 = smov [#allocation20]  ;;  %v916_v6 = vmov %v1761_v6  ;;  %v919_v7 = vmov %v1763_v7  ;;  %v967_v15 = vld [vmem:[#allocation12] sm:$0x3]  ;;  %v973_v16 = vld [vmem:[#allocation14] sm:$0x3]  ;;  %s2043_s17 = scalar_lea.vmem [#allocation13], %s1757_s28 }
 0x3ba   : > { %v936_v6 = vmov %v1761_v6  ;;  %v939_v7 = vmov %v1763_v7  ;;  %v920_v17 = vld [vmem:[%s912_s23] sm:$0x3]  ;;  %vm923_vm9 = vcmp.eq.s32.totalorder %v919_v7, %v916_v6  ;;  %969 = vst [vmem:[%s2043_s17] sm:$0x3] %v967_v15  ;;  %s2044_s27 = scalar_lea.vmem [#allocation15], %s1757_s28  ;;  %s932_s29 = smov [#allocation23] }
 0x3bb   : > { %vm943_vm10 = vcmp.eq.s32.totalorder %v939_v7, %v936_v6  ;;  %975 = vst [vmem:[%s2044_s27] sm:$0x3] %v973_v16  ;;  %v979_v18 = vld [vmem:[#allocation16] sm:$0x3]  ;;  %v924_v19 = vsel %vm923_vm9, %v920_v17, 0.0  ;;  %s2045_s16 = scalar_lea.vmem [#allocation17], %s1757_s28  ;;  %s2046_s30 = scalar_lea.vmem [#allocation19], %s1757_s28 }
 0x3bc   : > { %981 = vst [vmem:[%s2045_s16] sm:$0x3] %v979_v18  ;;  %v985_v20 = vld [vmem:[#allocation18] sm:$0x3]  ;;  %v925_v21 = vrot.slane %v924_v19, 4  ;;  %v940_v22 = vld [vmem:[%s932_s29] sm:$0x3] }
 0x3bd   : > { %987 = vst [vmem:[%s2046_s30] sm:$0x3] %v985_v20  ;;  %v944_v23 = vsel %vm943_vm10, %v940_v22, 0.0  ;;  %s908_s21 = sand.u32 7, %s1720_s12   ;;  %s2047_s11 = scalar_lea.vmem [#allocation9], %s1759_s18 }
 0x3be   : > { %v926_v24 = vadd.f32 %v925_v21, %v924_v19  ;;  %v945_v25 = vrot.slane %v944_v23, 4  ;;  %s909_s25 = scalar_lea.vmem [#allocation8], %s908_s21  ;;  %s911_s26 = scalar_lea.vmem [#allocation10], %s908_s21 }
 0x3bf   : > { %s913_s25 = smov %s909_s25  ;;  %s933_s26 = smov %s911_s26 }
 0x3c0   : > { %v927_v26 = vrot.slane %v926_v24, 2  ;;  %v946_v6 = vadd.f32 %v945_v25, %v944_v23  ;;  %s2048_s22 = scalar_lea.vmem [#allocation11], %s1759_s18  ;;  %s1015_s14 = sshrl.u32 (%p1734_p3), %s1720_s12, 3 }
 0x3c1   : > { %s2049_s20 = scalar_lea.vmem (%p1734_p3), [#allocation9], %s1759_s18  ;;  %s1544_s15 = sshll.u32 (%p1734_p3), %s1015_s14, 1 }
 0x3c2   : > { %v928_v7 = vadd.f32 %v927_v26, %v926_v24  ;;  %v947_v27 = vrot.slane %v946_v6, 2  ;;  %s1017_s17 = scalar_lea.vmem (%p1734_p3), %s2034_s4, %s1544_s15 }
 0x3c4   : > { %v929_v28 = vrot.slane %v928_v7, 1  ;;  %v948_v29 = vadd.f32 %v947_v27, %v946_v6 }
 0x3c6   : > { %v930_v30 = vadd.f32 %v929_v28, %v928_v7  ;;  %v949_v31 = vrot.slane %v948_v29, 1 }
 0x3c8   : > { %931 = vst [vmem:[%s913_s25] sm:$0x1] %v930_v30  ;;  %v950_v32 = vadd.f32 %v949_v31, %v948_v29 }
 0x3ca   : > { %951 = vst [vmem:[%s933_s26] sm:$0x1] %v950_v32 }
 0x3cc   : > { %1014 = sbr.rel (!%p1734_p3) target bundleno = 985 (0x3d9), region = 158 }
 0x3cf   : > { %v955_v33 = vld [vmem:[#allocation8] sm:$0x3] }
 0x3d0   : > { %957 = vst [vmem:[%s2047_s11] sm:$0x3] %v955_v33 }
 0x3d1   : > { %v961_v34 = vld [vmem:[#allocation10] sm:$0x3] }
 0x3d2   : > { %963 = vst [vmem:[%s2048_s22] sm:$0x3] %v961_v34 }
 0x3d7   : > { %v1033_v35 = vld [vmem:[%s2049_s20] sm:$0x3] }
 0x3d8   : > { %1034 = vst [vmem:[%s1017_s17] sm:$0x3] %v1033_v35 }
 0x3d9 PF: > { %1051 = sbr.rel (!%p1734_p3) target bundleno = 993 (0x3e1), region = 192  ;;  %s1052_s27 = sshrl.u32 (%p1734_p3), %s1720_s12, 3 }
 0x3da   : > { %s2050_s29 = scalar_lea.vmem (%p1734_p3), [#allocation11], %s1759_s18  ;;  %s1545_s16 = sshll.u32 (%p1734_p3), %s1052_s27, 1 }
 0x3db   : > { %s1054_s25 = scalar_lea.vmem (%p1734_p3), %s2035_s5, %s1545_s16 }
 0x3df   : > { %v1070_v36 = vld [vmem:[%s2050_s29] sm:$0x3] (%p1734_p3) }
 0x3e0   : > { %1071 = vst [vmem:[%s1054_s25] sm:$0x3] %v1070_v36 }
 0x3e1 PF: > { %s1546_s26 = sshll.u32 %s1720_s12, 1  ;;  %s2051_s19 = scalar_lea.vmem [#allocation13], %s1757_s28 }
 0x3e2   : > { %v1103_v37 = vld [vmem:[%s2051_s19] sm:$0x3]  ;;  %s2052_s11 = scalar_lea.vmem [#allocation15], %s1757_s28  ;;  %s1087_s14 = scalar_lea.vmem %s2036_s6, %s1546_s26 }
 0x3e3   : > { %v1136_v38 = vld [vmem:[%s2052_s11] sm:$0x3]  ;;  %s1120_s24 = scalar_lea.vmem %s2037_s7, %s1546_s26  ;;  %s2053_s23 = scalar_lea.vmem [#allocation17], %s1757_s28  ;;  %1104 = vst [vmem:[%s1087_s14] sm:$0x3] %v1103_v37 }
 0x3e4   : > { %v1169_v39 = vld [vmem:[%s2053_s23] sm:$0x3]  ;;  %s2054_s17 = scalar_lea.vmem [#allocation19], %s1757_s28  ;;  %1137 = vst [vmem:[%s1120_s24] sm:$0x3] %v1136_v38  ;;  %s1153_s29 = scalar_lea.vmem %s2038_s8, %s1546_s26 }
 0x3e5   : > { %v1202_v40 = vld [vmem:[%s2054_s17] sm:$0x3]  ;;  %s1186_s21 = scalar_lea.vmem %s2039_s9, %s1546_s26  ;;  %1170 = vst [vmem:[%s1153_s29] sm:$0x3] %v1169_v39 }
 0x3e6   : > { %1203 = vst [vmem:[%s1186_s21] sm:$0x3] %v1202_v40 }
 0x3e7 PF: > { %s2055_s25 = sld [smem:[#allocation33_spill]]  ;;  %p13_p13 = scmp.ge.s32.totalorder %s1723_s13, 4  }
 0x3e8   : > { %s2056_s30 = smov %s1637_s10  ;;  %s2058_s11 = smov %s1723_s13 }
 0x3e9   :  { %15 = sbr.rel (!%p13_p13) target bundleno = 2 (0x2), region = 484 }
 0x3ed   : > { %s2057_s10 = smov %s2055_s25 }

// kernel: reverse
= control target key start
LH: loop header
LB: loop body
LE: loop exit
PB: predicated region body
PF: predicated region fallthrough
CT: control target
= control target key end

     0   :  { %v2_v0 = vlaneseq  ;;  %s105_s0 = inlined_call_operand.vmem [shape: f32[2,3], index: 0, kind: input, shape index: {}]   ;;  %s106_s1 = inlined_call_operand.vmem [shape: f32[2,3], index: 1, kind: output, shape index: {}]  }
   0x2   :  { %v3_v1 = vsub.s32 2, %v2_v0 }
   0x4   :  { %4 = vset.pattern.permute.xlu0 %v3_v1 }
   0x5   :  { %v20_v2 = vld [vmem:[%s105_s0] sm:$0x3] }
   0x6   :  { %21 = vst [vmem:[#allocation1] sm:$0x3] %v20_v2 }
   0xd   :  { %v38_v3 = vld [vmem:[#allocation1] sm:$0x3] }
   0xe   :  { %39 = vst [vmem:[#allocation0] sm:$0x3] %v38_v3 }
  0x15   :  { %v40_v4 = vld [vmem:[#allocation0] sm:$0xff] }
  0x16   :  { %41 = vperm.xlu0 %4, %v40_v4  }
  0x95   :  { %v42_v5 = vpop.permute.xlu0 %41 }
  0x96   :  { %43 = vst [vmem:[#allocation2] sm:$0xff] %v42_v5 }
  0x9d   :  { %v47_v6 = vld [vmem:[#allocation2] sm:$0x3] }
  0x9e   :  { %49 = vst [vmem:[#allocation3] sm:$0x3] %v47_v6 }
  0xa5   :  { %v65_v7 = vld [vmem:[#allocation3] sm:$0x3] }
  0xa6   :  { %66 = vst [vmem:[%s106_s1] sm:$0x3] %v65_v7 }

// kernel: custom-call.16
= control target key start
LH: loop header
LB: loop body
LE: loop exit
PB: predicated region body
PF: predicated region fallthrough
CT: control target
= control target key end

     0   :  { %s653_s9 = smov 0   ;;  %s655_s10 = smov 0   ;;  %s799_s0 = inlined_call_operand.vmem [shape: f32[2,3,3], index: 0, kind: input, shape index: {}]   ;;  %s800_s1 = inlined_call_operand.vmem [shape: f32[2,3,3], index: 1, kind: output, shape index: {0}]   ;;  %s801_s2 = inlined_call_operand.vmem [shape: f32[2,3], index: 2, kind: output, shape index: {1}]  }
   0x1   :  { %s657_s11 = smov 0   ;;  %s659_s12 = smov 0  }
   0x2   :  { %s661_s13 = smov 0  }
   0x3 LB: > { %s28_s14 = sadd.s32 1, %s626_s12  ;;  %s508_s15 = sadd.s32 4294967295, %s630_s13   ;;  %s630_s13 = sphi %s661_s13, %s9_s13   ;;  %s626_s12 = sphi %s659_s12, %s808_s12   ;;  %s622_s11 = sphi %s657_s11, %s807_s11   ;;  %s618_s10 = sphi %s655_s10, %s806_s10   ;;  %s614_s9 = sphi %s653_s9, %s805_s9  }
   0x4   : > { %p30_p0 = scmp.ge.s32.totalorder %s28_s14, 2  ;;  %s33_s16 = ssub.s32 0, %s626_s12 }
   0x5   : > { %s510_s17 = smin.u32 %s626_s12, %s33_s16  ;;  %p57_p1 = scmp.ne.s32.totalorder %s618_s10, %s614_s9 }
   0x6   : > { %s810_s14 = smov (%p30_p0, %s28_s14), 0  ;;  %s35_s18 = sshrl.u32 %s510_s17, 3 }
   0x7   : > { %s39_s19 = ssub.s32 0, %s810_s14  ;;  %p58_p2 = scmp.eq.s32.totalorder %s508_s15, 1 }
   0x8   : > { %s511_s20 = smin.u32 %s39_s19, %s810_s14  ;;  %s47_s24 = sadd.s32 1, %s618_s10 }
   0x9   : > { %s41_s21 = sshrl.u32 %s511_s20, 3  ;;  %p688_p3 = por %p58_p2, %p57_p1 }
   0xa   : > { %s44_s23 = ssub.s32 %s35_s18, %s41_s21  ;;  %p513_p5 = scmp.ge.s32.totalorder %s630_s13, 2 }
   0xb   : > { %p45_p4 = scmp.eq.s32.totalorder %s44_s23, 0  ;;  %s82_s26 = sand.u32 (!%p513_p5), 1, %s630_s13  }
   0xc   : > { %80 = sbr.rel (%p513_p5) target bundleno = 19 (0x13), region = 16  ;;  %s515_s27 = sshll.u32 (!%p513_p5), %s626_s12, 2 }
   0xd   : > { %s694_s25 = scalar_select %p45_p4, %s618_s10, %s47_s24  }
   0xe   : > { %s514_s28 = sshll.u32 (!%p513_p5), %s82_s26, 2  ;;  %s88_s3 = scalar_lea.vmem (!%p513_p5), %s799_s0, %s515_s27 }
   0xf   : > { %v104_v0 = vld [vmem:[%s88_s3] sm:$0xf] (!%p513_p5)  ;;  %s84_s4 = scalar_lea.vmem (!%p513_p5), [#allocation1], %s514_s28 }
  0x10   : > { %105 = vst [vmem:[%s84_s4] sm:$0xf] (!%p513_p5), %v104_v0 }
  0x13 PF: > { %p516_p6 = scmp.ge.s32.totalorder %s630_s13, 1  ;;  %p121_p7 = scmp.lt.s32.totalorder %s630_s13, 3 }
  0x15   : > { %p122_p8 = pnand %p516_p6, %p121_p7 }
  0x17   : > { %125 = sbr.rel (%p122_p8) target bundleno = 346 (0x15a), region = 50 }
  0x1e   : > { %s132_s5 = sand.u32 1, %s508_s15   ;;  %s142_s6 = sand.u32 1, %s614_s9   ;;  %v636_v2 = vmov 0.0  }
  0x1f   : > { %s517_s7 = sshll.u32 %s132_s5, 2  ;;  %s705_s8 = sshll.u32 %s142_s6, 1 }
  0x20   : > { %s134_s16 = scalar_lea.vmem [#allocation1], %s517_s7  ;;  %s155_s17 = sand.u32 7, %s622_s11  }
  0x21   : > { %v147_v1 = vld [vmem:[%s134_s16] sm:$0xf]  ;;  %s708_s18 = scalar_lea.vmem [#allocation4], %s155_s17  ;;  %s711_s19 = scalar_lea.vmem [#allocation3], %s517_s7 }
  0x22   : > { %148 = vst [vmem:[#allocation0] sm:$0xf] %v147_v1  ;;  %159 = vst [vmem:[%s708_s18] sm:$0x1] %v636_v2  ;;  %s144_s15 = scalar_lea.vmem [#allocation5], %s705_s8  ;;  %s714_s20 = smov 0  }
  0x29   : > { %v157_v3 = vld [vmem:[#allocation0] sm:$0xff] }
  0x2a   : > { %158 = vst [vmem:[#allocation2] sm:$0xff] %v157_v3 }
  0x2b LB: >> { %v167_v4 = vlaneseq  ;;  %v723_v6 = vstv %s634_s20  ;;  %s194_s9 = scalar_lea.vmem [#allocation2], %s634_s20  ;;  %s230_s21 = smov [#allocation2]  ;;  %v637_v60 = vmov 1.0   ;;  %v265_v61 = vld [vmem:[%s708_s18] ss:$0 sm:$0xff]  ;;  %s634_s20 = sphi %s714_s20, %s165_s20  }
  0x2c   : >> { %s252_s23 = scalar_lea.vmem [#allocation6], %s634_s20  ;;  %s268_s24 = smov [#allocation2] }
  0x2d   : >> { %v720_v5 = vshrl.u32 %v167_v4, 7  ;;  %v246_v49 = vand.u32 127, %v167_v4  ;;  %s269_s26 = smov [#allocation6] }
  0x2f   : >> { %vm171_vm0 = vcmp.gt.s32.totalorder %v720_v5, %v723_v6  ;;  %vm172_vm1 = vcmp.lt.s32.totalorder %v720_v5, 3  ;;  %v233_v5 = vmov %v720_v5  ;;  %vm738_vm12 = vcmp.eq.s32.totalorder %v246_v49, %v723_v6 }
  0x30   : >> { %vm173_vm2 = vmand %vm171_vm0, %vm172_vm1  ;;  %vm237_vm9 = vcmp.gt.s32.totalorder %v233_v5, %v723_v6  ;;  %vm238_vm10 = vcmp.lt.s32.totalorder %v233_v5, 3  ;;  %v272_v5 = vmov %v720_v5  ;;  %vm298_vm15 = vcmp.gt.s32.totalorder %v246_v49, %v723_v6 }
  0x31   : >> { %v166_v7 = vld [vmem:[#allocation2] sm:$0xff]  ;;  %v195_v16 = vld [vmem:[%s194_s9] ss:$0 sm:$0xff]  ;;  %vm239_vm11 = vmand %vm237_vm9, %vm238_vm10  ;;  %vm277_vm13 = vcmp.lt.s32.totalorder %v272_v5, 3  ;;  %v289_v5 = vmov %v720_v5 }
  0x32   : >> { %v174_v8 = vsel %vm173_vm2, %v166_v7, 0.0  ;;  %v196_v17 = vand.u32 2147483647, %v195_v16  ;;  %vm221_vm8 = vcmp.lt.f32.partialorder %v195_v16, 0.0  ;;  %v234_v46 = vld [vmem:[%s230_s21] sm:$0xff]  ;;  %vm306_vm14 = vcmp.ge.s32.totalorder %v289_v5, %v723_v6 }
  0x33   : >> { %v175_v9 = vmul.f32 %v174_v8, %v174_v8  ;;  %v240_v50 = vsel %vm239_vm11, %v234_v46, 0.0  ;;  %v275_v0 = vld [vmem:[%s268_s24] sm:$0xff]  ;;  %s285_s24 = smov %s268_s24  ;;  %vm307_vm0 = vmand %vm738_vm12, %vm306_vm14 }
  0x34   : >> { %v197_v22 = vmax.f32 %v196_v17, 0.0  ;;  %s310_s27 = scalar_lea.vmem %s285_s24, %s634_s20  ;;  %s165_s20 = sadd.s32 1, %s634_s20  }
  0x35   : >> { %v176_v10 = vrot.slane %v175_v9, 4  ;;  %p162_p9 = scmp.ge.s32.totalorder %s165_s20, 3  }
  0x36   : > { %s523_s28 = sshll.u32 (%p162_p9), %s622_s11, 2 }
  0x37   : >> { %v177_v11 = vadd.f32 %v176_v10, %v175_v9  ;;  %s341_s3 = scalar_lea.vmem (%p162_p9), %s800_s1, %s523_s28 }
  0x39   : >> { %v178_v12 = vrot.slane %v177_v11, 2 }
  0x3b   : >> { %v179_v13 = vadd.f32 %v178_v12, %v177_v11 }
  0x3d   : >> { %v180_v14 = vrot.slane %v179_v13, 1 }
  0x3f   : >> { %v181_v15 = vadd.f32 %v180_v14, %v179_v13  ;;  %v296_v14 = vld [vmem:[%s285_s24] sm:$0xff] }
  0x41   : >> { %578 = vrsqrt.f32 %v181_v15  ;;  %vm184_vm3 = vcmp.eq.f32.partialorder %v181_v15, inf  ;;  %v187_v19 = vand.u32 2147483648, %v181_v15  ;;  %vm186_vm4 = vcmp.eq.f32.partialorder %v181_v15, 0.0 }
  0x4b   : >> { %v579_v18 = vpop.eup %578 }
  0x4c   : >> { %v183_v20 = vmul.f32 %v579_v18, %v181_v15 }
  0x4e   : >> { %v185_v21 = vsel %vm184_vm3, %v181_v15, %v183_v20 }
  0x4f   : >> { %v188_v23 = vsel %vm186_vm4, %v187_v19, %v185_v21 }
  0x50   : >> { %v198_v24 = vand.u32 2147483647, %v188_v23 }
  0x52   : >> { %v199_v25 = vmax.f32 %v197_v22, %v198_v24 }
  0x54   : >> { %580 = vrcp.f32 %v199_v25  ;;  %vm211_vm7 = vcmp.eq.f32.partialorder %v199_v25, 0.0 }
  0x5e   : >> { %v581_v26 = vpop.eup %580 }
  0x5f   : >> { %v201_v27 = vmul.f32 %v581_v26, %v196_v17  ;;  %v204_v28 = vmul.f32 0.0, %v581_v26  ;;  %v208_v29 = vmul.f32 %v581_v26, %v198_v24 }
  0x61   : >> { %v202_v30 = vmul.f32 %v201_v27, %v201_v27  ;;  %v205_v31 = vmul.f32 %v204_v28, %v204_v28  ;;  %v209_v32 = vmul.f32 %v208_v29, %v208_v29 }
  0x63   : >> { %v206_v33 = vadd.f32 %v205_v31, %v202_v30 }
  0x65   : >> { %v210_v34 = vadd.f32 %v209_v32, %v206_v33 }
  0x67   : >> { %582 = vrsqrt.f32 %v210_v34  ;;  %vm214_vm5 = vcmp.eq.f32.partialorder %v210_v34, inf  ;;  %v217_v36 = vand.u32 2147483648, %v210_v34  ;;  %vm216_vm6 = vcmp.eq.f32.partialorder %v210_v34, 0.0 }
  0x71   : >> { %v583_v35 = vpop.eup %582 }
  0x72   : >> { %v213_v37 = vmul.f32 %v583_v35, %v210_v34 }
  0x74   : >> { %v215_v38 = vsel %vm214_vm5, %v210_v34, %v213_v37 }
  0x75   : >> { %v218_v39 = vsel %vm216_vm6, %v217_v36, %v215_v38 }
  0x76   : >> { %v219_v40 = vmul.f32 %v218_v39, %v199_v25 }
  0x78   : >> { %v220_v41 = vsel %vm211_vm7, 0.0, %v219_v40 }
  0x79   : >> { %v222_v42 = vxor.u32 2147483648, %v220_v41 }
  0x7b   : >> { %v223_v43 = vsel %vm221_vm8, %v220_v41, %v222_v42 }
  0x7c   : >> { %v731_v44 = vsel %vm186_vm4, %v195_v16, %v223_v43  ;;  %584 = vrcp.f32 %v223_v43  ;;  %v224_v47 = vsub.f32 %v223_v43, %v195_v16 }
  0x7d   : >> { %v229_v45 = vsub.f32 %v195_v16, %v731_v44 }
  0x7f   : >> { %586 = vrcp.f32 %v229_v45 }
  0x86   : >> { %v585_v48 = vpop.eup %584 }
  0x87   : >> { %v226_v51 = vmul.f32 %v585_v48, %v224_v47 }
  0x89   : >> { %v587_v52 = vpop.eup %586  ;;  %v228_v56 = vsel %vm186_vm4, 0.0, %v226_v51 }
  0x8a   : >> { %v242_v53 = vmul.f32 %v587_v52, %v240_v50  ;;  %v258_v58 = vsel %vm738_vm12, %v228_v56, 0.0 }
  0x8c   : >> { %v243_v55 = vsel %vm186_vm4, 0.0, %v242_v53 }
  0x8d   : >> { %v248_v57 = vsel %vm738_vm12, %v243_v55, 0.0 }
  0x8e   : >> { %249 = vadd.xlane.f32.xlu0 %v248_v57 }
  0x92   : >> { %259 = vadd.xlane.f32.xlu0 %v258_v58 }
 0x11b   : >> { %v250_v59 = vpop.xlane.xlu0 %249 }
 0x11c   : >> { %251 = vst [vmem:[#allocation6] sm:$0xff] %v250_v59 }
 0x11d   : >> { %253 = vst [vmem:[%s252_s23] sm:$0x1] %v637_v60 }
 0x11f   : >> { %v260_v62 = vpop.xlane.xlu0 %259 }
 0x120   : >> { %v266_v63 = vsel %vm738_vm12, %v260_v62, %v265_v61 }
 0x121   : >> { %267 = vst [vmem:[%s708_s18] sm:$0x1] %v266_v63 }
 0x124   : >> { %v274_v1 = vld [vmem:[%s269_s26] sm:$0xff]  ;;  %s286_s26 = smov %s269_s26 }
 0x125   : >> { %v276_v2 = vmul.f32 %v275_v0, %v274_v1  ;;  %v294_v13 = vld [vmem:[%s286_s26] sm:$0xff] }
 0x127   : >> { %v278_v3 = vsel %vm277_vm13, %v276_v2, 0.0 }
 0x128   : >> { %v279_v4 = vrot.slane %v278_v3, 4  ;;  %v327_v6 = vld [vmem:[#allocation4] sm:$0x3] (%p162_p9) }
 0x129   : > { %329 = vst [vmem:[%s144_s15] sm:$0x3] (%p162_p9), %v327_v6 }
 0x12a   : >> { %v280_v7 = vadd.f32 %v279_v4, %v278_v3 }
 0x12c   : >> { %v281_v8 = vrot.slane %v280_v7, 2 }
 0x12e   : >> { %v282_v9 = vadd.f32 %v281_v8, %v280_v7 }
 0x130   : >> { %v283_v10 = vrot.slane %v282_v9, 1 }
 0x132   : >> { %v284_v11 = vadd.f32 %v283_v10, %v282_v9 }
 0x134   : >> { %v290_v12 = vmul.f32 %v284_v11, %v260_v62 }
 0x136   : >> { %v295_v15 = vmul.f32 %v294_v13, %v290_v12 }
 0x138   : >> { %v299_v16 = vsub.f32 %v296_v14, %v295_v15 }
 0x13a   : >> { %v300_v17 = vsel %vm298_vm15, %v299_v16, %v296_v14 }
 0x13b   : >> { %v308_v18 = vsel %vm307_vm0, %v294_v13, %v300_v17 }
 0x13c   : >> { %309 = vst [vmem:[%s285_s24] sm:$0xff] %v308_v18 }
 0x13f   : > { %164 = sbr.rel (!%p162_p9) target bundleno = 43 (0x2b), region = 167 }
 0x143   : >> { %v311_v19 = vld [vmem:[%s310_s27] ss:$0 sm:$0xff] }
 0x144   : >> { %v316_v20 = vsel %vm738_vm12, %v731_v44, %v311_v19 }
 0x145   : >> { %317 = vst [vmem:[%s310_s27] sm:$0x1] %v316_v20 }
 0x146   : > { %p376_p10 = scmp.lt.s32.totalorder (%p688_p3), %s622_s11, 0  ;;  %s377_s4 = ssub.s32 (%p688_p3), 0, %s622_s11  ;;  %v399_v22 = vld [vmem:[%s144_s15] sm:$0x3] (%p688_p3) }
 0x147   : > { %s524_s5 = smin.u32 (%p688_p3), %s622_s11, %s377_s4 }
 0x148   : > { %s379_s6 = sshrl.u32 (%p688_p3), %s524_s5, 3 }
 0x149   : > { %s380_s7 = ssub.s32 (%p688_p3), 0, %s379_s6 }
 0x14c   : > { %v321_v5 = vld [vmem:[#allocation2] sm:$0xf] }
 0x14d   : > { %323 = vst [vmem:[%s711_s19] sm:$0xf] %v321_v5 }
 0x14f   : > { %375 = sbr.rel (!%p688_p3) target bundleno = 346 (0x15a), region = 91 }
 0x154   : > { %v357_v21 = vld [vmem:[%s711_s19] sm:$0xf] }
 0x155   : > { %358 = vst [vmem:[%s341_s3] sm:$0xf] %v357_v21 }
 0x156   : > { %s812_s7 = smov (!%p376_p10, %s380_s7), %s379_s6 }
 0x157   : > { %s525_s16 = sshll.u32 %s812_s7, 1 }
 0x158   : > { %s383_s19 = scalar_lea.vmem %s801_s2, %s525_s16 }
 0x159   : > { %400 = vst [vmem:[%s383_s19] sm:$0x3] %v399_v22 }
 0x15a PF: > { %s9_s13 = sadd.s32 1, %s630_s13   ;;  %s805_s9 = smov %s618_s10 }
 0x15b   : > { %p6_p11 = scmp.ge.s32.totalorder %s9_s13, 4   ;;  %s806_s10 = smov %s694_s25 }
 0x15c   : > { %s807_s11 = smov %s626_s12  ;;  %s808_s12 = smov %s810_s14 }
 0x15d   :  { %8 = sbr.rel (!%p6_p11) target bundleno = 3 (0x3), region = 178 }

</bundles_post_ra>
